<compile_context>
chip_gen: v7x
topology: tpu7x:2x2x1
jax: 0.10.0
libtpu: 0.0.40
codegen_flags: <defaults>
</compile_context>

<pallas_src>
import math
from functools import partial

import numpy as np
import jax
import jax.numpy as jnp
from jax.experimental import pallas as pl
from jax.experimental.pallas import tpu as pltpu


# ---------------------------------------------------------------------------
# ray generation (verbatim from the reference module)
# ---------------------------------------------------------------------------
def generate_ray(ray_num):
    self_radius = 1.0
    self_azimuthal = 0.0
    n = int(math.ceil(np.sqrt((ray_num - 2) / 4)))
    azimuthal = 0.5 * np.pi / n
    ray_vector = []
    for a in range(-n, n + 1):
        self_polar = 0.0
        size = (n - abs(a)) * 4 or 1
        polar = 2 * math.pi / size
        for i in range(size):
            self_polar += polar
            r = np.sin(self_azimuthal) * self_radius
            x = np.cos(self_polar) * r
            y = np.sin(self_polar) * r
            z = np.cos(self_azimuthal) * self_radius
            ray_vector.append([x, y, z])
        self_azimuthal += azimuthal
    return np.array(ray_vector)


# ---------------------------------------------------------------------------
# small padding helpers
# ---------------------------------------------------------------------------
def _round_up(x, m):
    return ((x + m - 1) // m) * m


def _pad_to(x, axis, target):
    pad = target - x.shape[axis]
    if pad <= 0:
        return x
    cfg = [(0, 0)] * x.ndim
    cfg[axis] = (0, pad)
    return jnp.pad(x, cfg)


def _pad_params(params, cin_p):
    """Zero-pad (W, b) stack to sublane-aligned channel counts."""
    out = []
    prev = cin_p
    for (w, b) in params:
        cout = w.shape[0]
        cout_p = _round_up(cout, 8)
        w_p = _pad_to(_pad_to(w, 1, prev), 0, cout_p)
        b_p = _pad_to(b, 0, cout_p)
        out.append((w_p, b_p))
        prev = cout_p
    return out, prev


# ---------------------------------------------------------------------------
# fused MLP kernel: whole Conv1d(1x1) stack in one pallas_call
# ---------------------------------------------------------------------------
def _fused_mlp_kernel(*refs, n_layers, relu_flags):
    x_ref = refs[0]
    o_ref = refs[-1]
    h = x_ref[...]
    for i in range(n_layers):
        w = refs[1 + 2 * i][...]
        b = refs[2 + 2 * i][...]
        h = jnp.dot(w, h, preferred_element_type=jnp.float32) + b
        if relu_flags[i]:
            h = jnp.maximum(h, 0.0)
    o_ref[...] = h


def fused_mlp(x, params, *, last_relu=False, tile_lanes=512):
    """x: (B, Cin, N); params: list of (W (Cout,Cin), b (Cout,1)) -> (B, Cout, N).

    One pallas_call for the whole stack. Batch is folded into the lane axis
    (exact for 1x1 conv), lanes padded to a multiple of 128, channels to 8.
    """
    B, Cin, N = x.shape
    n = len(params)
    relu_flags = tuple(bool(last_relu or (i < n - 1)) for i in range(n))

    L = B * N
    x2 = jnp.transpose(x, (1, 0, 2)).reshape(Cin, L)

    Cin_p = _round_up(Cin, 8)
    x2 = _pad_to(x2, 0, Cin_p)
    padded_params, Cout_p = _pad_params(params, Cin_p)
    Cout = params[-1][0].shape[0]

    L_128 = _round_up(L, 128)
    TL = L_128 if L_128 <= tile_lanes else tile_lanes
    L_p = _round_up(L, TL)
    x2 = _pad_to(x2, 1, L_p)
    grid_l = L_p // TL

    in_specs = [pl.BlockSpec((Cin_p, TL), lambda l: (0, l))]
    args = [x2]
    for (w_p, b_p) in padded_params:
        in_specs.append(pl.BlockSpec(w_p.shape, lambda l: (0, 0)))
        in_specs.append(pl.BlockSpec(b_p.shape, lambda l: (0, 0)))
        args += [w_p, b_p]

    out = pl.pallas_call(
        partial(_fused_mlp_kernel, n_layers=n, relu_flags=relu_flags),
        out_shape=jax.ShapeDtypeStruct((Cout_p, L_p), jnp.float32),
        grid=(grid_l,),
        in_specs=in_specs,
        out_specs=pl.BlockSpec((Cout_p, TL), lambda l: (0, l)),
        compiler_params=pltpu.CompilerParams(dimension_semantics=("parallel",)),
    )(*args)

    out = out[:Cout, :L].reshape(Cout, B, N)
    return jnp.transpose(out, (1, 0, 2))


# ---------------------------------------------------------------------------
# fused PointNet-SA kernel: shared MLP + masked neighbour max-pool
# ---------------------------------------------------------------------------
def _sa_fused_kernel(x_ref, m_ref, w1_ref, b1_ref, w2_ref, b2_ref, o_ref, *, nsample):
    w1 = w1_ref[...]
    b1 = b1_ref[...]
    w2 = w2_ref[...]
    b2 = b2_ref[...]
    acc = None
    # unrolled loop over neighbours: per-neighbour MXU matmuls + running VPU max
    for s in range(nsample):
        xs = x_ref[s]  # (Cin_p, TM)
        h = jnp.maximum(jnp.dot(w1, xs, preferred_element_type=jnp.float32) + b1, 0.0)
        h = jnp.maximum(jnp.dot(w2, h, preferred_element_type=jnp.float32) + b2, 0.0)
        acc = h if acc is None else jnp.maximum(acc, h)
    # zero_query=True: explicit where (robust even without a final ReLU)
    o_ref[...] = jnp.where(m_ref[...] > 0.0, acc, 0.0)


def pointnet_sa_fused(xyz, features, new_xyz, radius, nsample, mlp_params,
                      *, tile_m=512):
    """PointnetSAModuleSSGFBS (zero_query=True): group -> shared MLP -> masked max."""
    B, N, _ = xyz.shape
    M = new_xyz.shape[1]
    C = features.shape[1]

    idx, cnt = ball_query(radius, nsample, xyz, new_xyz)               # (B, M, ns)
    g_xyz = gather_points(xyz, idx) - new_xyz[:, :, None, :]           # (B, M, ns, 3)
    g_feat = gather_points(jnp.transpose(features, (0, 2, 1)), idx)    # (B, M, ns, C)
    grouped = jnp.concatenate([g_xyz, g_feat], axis=-1)                # (B, M, ns, 3+C)
    grouped = jnp.transpose(grouped, (0, 2, 3, 1))                     # (B, ns, 3+C, M)

    Cin = 3 + C
    Cin_p = _round_up(Cin, 8)
    M_128 = _round_up(M, 128)
    TM = M_128 if M_128 <= tile_m else tile_m
    M_p = _round_up(M, TM)
    grouped = _pad_to(_pad_to(grouped, 2, Cin_p), 3, M_p)

    (w1, b1), (w2, b2) = mlp_params
    C1, C2 = w1.shape[0], w2.shape[0]
    C1_p = _round_up(C1, 8)
    C2_p = _round_up(C2, 8)
    w1p = _pad_to(_pad_to(w1, 1, Cin_p), 0, C1_p)
    b1p = _pad_to(b1, 0, C1_p)
    w2p = _pad_to(_pad_to(w2, 1, C1_p), 0, C2_p)
    b2p = _pad_to(b2, 0, C2_p)

    mask = _pad_to((cnt > 0).astype(jnp.float32)[:, None, :], 2, M_p)  # (B, 1, M_p)

    out = pl.pallas_call(
        partial(_sa_fused_kernel, nsample=nsample),
        out_shape=jax.ShapeDtypeStruct((B, C2_p, M_p), jnp.float32),
        grid=(B, M_p // TM),
        in_specs=[
            pl.BlockSpec((None, nsample, Cin_p, TM), lambda b, m: (b, 0, 0, m)),
            pl.BlockSpec((None, 1, TM), lambda b, m: (b, 0, m)),
            pl.BlockSpec((C1_p, Cin_p), lambda b, m: (0, 0)),
            pl.BlockSpec((C1_p, 1), lambda b, m: (0, 0)),
            pl.BlockSpec((C2_p, C1_p), lambda b, m: (0, 0)),
            pl.BlockSpec((C2_p, 1), lambda b, m: (0, 0)),
        ],
        out_specs=pl.BlockSpec((None, C2_p, TM), lambda b, m: (b, 0, m)),
        compiler_params=pltpu.CompilerParams(
            dimension_semantics=("parallel", "parallel")),
    )(grouped, mask, w1p, b1p, w2p, b2p)

    return new_xyz, out[:, :C2, :M], idx


# ---------------------------------------------------------------------------
# fused intersection MLP: split first-layer weight, no repeat/concat in HBM
# ---------------------------------------------------------------------------
def _intersection_kernel(ray_ref, e_ref, agg_ref, wa_ref, wr_ref,
                         b1_ref, w2_ref, b2_ref, o_ref):
    # project the aggregated branch once per proposal, then broadcast to ray
    # lanes with the constant 0/1 expansion matrix (pure MXU, no gather).
    a = jnp.dot(wa_ref[...], agg_ref[...], preferred_element_type=jnp.float32) + b1_ref[...]
    a_rep = jnp.dot(a, e_ref[...], preferred_element_type=jnp.float32)
    r = jnp.dot(wr_ref[...], ray_ref[...], preferred_element_type=jnp.float32)
    h = jnp.maximum(a_rep + r, 0.0)
    o_ref[...] = jnp.dot(w2_ref[...], h, preferred_element_type=jnp.float32) + b2_ref[...]


def fused_intersection(agg_features, ray_features, params, rep, *, tile_lanes=512):
    """MLP(concat([repeat(agg, rep), ray], axis=1)) without the repeat/concat.

    agg_features: (B, Cagg, P), ray_features: (B, Cray, P*rep),
    params: [(W1 (C1, Cagg+Cray), b1), (W2 (2, C1), b2)] -> (B, 2, P*rep).
    """
    B, Cagg, P = agg_features.shape
    _, Cray, L0 = ray_features.shape
    assert L0 == P * rep
    (w1, b1), (w2, b2) = params
    C1, C2 = w1.shape[0], w2.shape[0]
    wa, wr = w1[:, :Cagg], w1[:, Cagg:]

    # collapse batch into lanes
    agg2 = jnp.transpose(agg_features, (1, 0, 2)).reshape(Cagg, B * P)
    ray2 = jnp.transpose(ray_features, (1, 0, 2)).reshape(Cray, B * L0)
    BP, L = B * P, B * L0

    Cagg_p = _round_up(Cagg, 8)
    Cray_p = _round_up(Cray, 8)
    C1_p = _round_up(C1, 8)
    C2_p = _round_up(C2, 8)
    BP_p = _round_up(BP, 8)
    L_128 = _round_up(L, 128)
    TL = L_128 if L_128 <= tile_lanes else tile_lanes
    L_p = _round_up(L, TL)

    agg2 = _pad_to(_pad_to(agg2, 0, Cagg_p), 1, BP_p)
    ray2 = _pad_to(_pad_to(ray2, 0, Cray_p), 1, L_p)
    wa_p = _pad_to(_pad_to(wa, 1, Cagg_p), 0, C1_p)
    wr_p = _pad_to(_pad_to(wr, 1, Cray_p), 0, C1_p)
    b1_p = _pad_to(b1, 0, C1_p)
    w2_p = _pad_to(_pad_to(w2, 1, C1_p), 0, C2_p)
    b2_p = _pad_to(b2, 0, C2_p)

    # expansion matrix: E[bp, l] = 1 iff l // rep == bp (only for real lanes)
    lane = np.arange(L_p)
    e_np = (lane[None, :] // rep) == np.arange(BP_p)[:, None]
    e_np = np.where(lane[None, :] < L, e_np, False).astype(np.float32)
    e = jnp.asarray(e_np)

    grid_l = L_p // TL
    out = pl.pallas_call(
        _intersection_kernel,
        out_shape=jax.ShapeDtypeStruct((C2_p, L_p), jnp.float32),
        grid=(grid_l,),
        in_specs=[
            pl.BlockSpec((Cray_p, TL), lambda l: (0, l)),
            pl.BlockSpec((BP_p, TL), lambda l: (0, l)),
            pl.BlockSpec((Cagg_p, BP_p), lambda l: (0, 0)),
            pl.BlockSpec((C1_p, Cagg_p), lambda l: (0, 0)),
            pl.BlockSpec((C1_p, Cray_p), lambda l: (0, 0)),
            pl.BlockSpec((C1_p, 1), lambda l: (0, 0)),
            pl.BlockSpec((C2_p, C1_p), lambda l: (0, 0)),
            pl.BlockSpec((C2_p, 1), lambda l: (0, 0)),
        ],
        out_specs=pl.BlockSpec((C2_p, TL), lambda l: (0, l)),
        compiler_params=pltpu.CompilerParams(dimension_semantics=("parallel",)),
    )(ray2, e, agg2, wa_p, wr_p, b1_p, w2_p, b2_p)

    out = out[:C2, :L].reshape(C2, B, L0)
    return jnp.transpose(out, (1, 0, 2))


# ---------------------------------------------------------------------------
# MLP parameter init (Conv1d 1x1 stacks)
# ---------------------------------------------------------------------------
def init_mlp_params(key, in_channel, conv_channels):
    params = []
    prev = in_channel
    for c in conv_channels:
        key, k_w, k_b = jax.random.split(key, 3)
        w = jax.random.normal(k_w, (c, prev), jnp.float32) / np.sqrt(prev)
        b = 0.01 * jax.random.normal(k_b, (c, 1), jnp.float32)
        params.append((w, b))
        prev = c
    return params
    # TODO(synk): BatchNorm of the reference MLP is folded to identity
    # (synthetic deterministic weights); fold trained BN into (w, b) for ckpts.


# ---------------------------------------------------------------------------
# point-cloud primitives (data-dependent; plain JAX glue)
# ---------------------------------------------------------------------------
def gather_points(points, idx):
    """points (B, N, C), idx (B, ...) int -> (B, ..., C)."""
    B = points.shape[0]
    C = points.shape[-1]
    flat = idx.reshape(B, -1)
    gidx = jnp.broadcast_to(flat[:, :, None], (B, flat.shape[1], C))
    g = jnp.take_along_axis(points, gidx, axis=1)
    return g.reshape(idx.shape + (C,))


def farthest_point_sample(xyz, npoint):
    B, N, _ = xyz.shape

    def body(i, state):
        idxs, dist, far = state
        idxs = idxs.at[:, i].set(far)
        cidx = jnp.broadcast_to(far[:, None, None], (B, 1, 3))
        centroid = jnp.take_along_axis(xyz, cidx, axis=1)
        d = jnp.sum((xyz - centroid) ** 2, axis=-1)
        dist = jnp.minimum(dist, d)
        far = jnp.argmax(dist, axis=-1).astype(jnp.int32)
        return idxs, dist, far

    init = (jnp.zeros((B, npoint), jnp.int32),
            jnp.full((B, N), 1e10, jnp.float32),
            jnp.zeros((B,), jnp.int32))
    idxs, _, _ = jax.lax.fori_loop(0, npoint, body, init)
    return idxs


def three_nn(unknown, known):
    d2 = jnp.sum((unknown[:, :, None, :] - known[:, None, :, :]) ** 2, axis=-1)
    neg, idx = jax.lax.top_k(-d2, 3)
    return jnp.sqrt(jnp.maximum(-neg, 0.0)), idx.astype(jnp.int32)


def three_interpolate(features, idx, weight):
    """features (B, C, N), idx/weight (B, M, 3) -> (B, C, M)."""
    ft = jnp.transpose(features, (0, 2, 1))
    g = gather_points(ft, idx)                       # (B, M, 3, C)
    out = jnp.sum(g * weight[..., None], axis=2)     # (B, M, C)
    return jnp.transpose(out, (0, 2, 1))


def ball_query(radius, nsample, xyz, new_xyz):
    """xyz (B, N, 3), new_xyz (B, M, 3) -> idx (B, M, nsample) int32, cnt (B, M)."""
    diff = new_xyz[:, :, None, :] - xyz[:, None, :, :]
    d2 = jnp.sum(diff * diff, axis=-1)                             # (B, M, N)
    N = xyz.shape[1]
    mask = d2 < radius * radius
    key = jnp.where(mask, jnp.arange(N, dtype=jnp.int32)[None, None, :], N)
    order = jnp.argsort(key, axis=-1)[:, :, :nsample].astype(jnp.int32)
    cnt = jnp.sum(mask, axis=-1).astype(jnp.int32)
    first = order[:, :, 0:1]
    slot = jnp.arange(nsample, dtype=jnp.int32)[None, None, :]
    idx = jnp.where(slot < cnt[:, :, None], order, first)
    idx = jnp.where(cnt[:, :, None] > 0, idx, 0)
    return idx, cnt


# ---------------------------------------------------------------------------
# RayBasedGrouping (JAX/Pallas re-implementation)
# ---------------------------------------------------------------------------
class RayBasedGroupingPallas:
    def __init__(self, model_cfg, key):
        self.ray_num = model_cfg['RAY_NUM']
        self.seed_feat_dim = model_cfg['SEED_FEAT_DIM']
        self.sample_bin_num = model_cfg['SAMPLE_BIN_NUM']
        self.sa_radius = model_cfg['SA_RADIUS']
        self.scale_ratio = model_cfg['SCALE_RATIO']
        self.fps_num_sample = model_cfg['FPS_NUM_SAMPLE']
        self.sa_num_sample = model_cfg['SA_NUM_SAMPLE']
        self.fine_sample_bin_num = model_cfg['FINE_SAMPLE_BIN_NUM']
        self.fine_sa_radius = model_cfg['FINE_SA_RADIUS']
        self.fine_sa_num_sample = model_cfg['FINE_SA_NUM_SAMPLE']
        self.reduce_seed_feat_dim = self.seed_feat_dim // 4
        self.num_seed_points = model_cfg['NUM_SEED_POINTS']
        red = self.reduce_seed_feat_dim

        keys = jax.random.split(key, 10)
        self.fine_sa_mlp = init_mlp_params(keys[0], red + 3, (red, red // 2))
        self.coarse_sa_mlp = init_mlp_params(keys[1], red + 3, (red, red // 2))
        self.seed_feat_reduce = init_mlp_params(
            keys[2], self.seed_feat_dim, (self.seed_feat_dim // 2, red))
        self.fine_intersection_module = init_mlp_params(
            keys[3], red // 2 + self.seed_feat_dim // 2, (red // 2, 2))
        self.coarse_intersection_module = init_mlp_params(
            keys[4], red // 2 + self.seed_feat_dim // 2, (red // 2, 2))
        self.fine_bin_reduce_dim = init_mlp_params(
            keys[5], self.fine_sample_bin_num * red // 2, (red // 2,))
        self.fine_ray_reduce_dim = init_mlp_params(
            keys[6], self.ray_num * red // 2, (self.seed_feat_dim, self.seed_feat_dim // 2))
        self.coarse_bin_reduce_dim = init_mlp_params(
            keys[7], self.sample_bin_num * red // 2, (red // 2,))
        self.coarse_ray_reduce_dim = init_mlp_params(
            keys[8], self.ray_num * red // 2, (self.seed_feat_dim, self.seed_feat_dim // 2))
        self.fuse_layer = init_mlp_params(
            keys[9], self.seed_feat_dim, (self.seed_feat_dim, self.seed_feat_dim // 2))
        self.ray_vector = jnp.asarray(generate_ray(self.ray_num), jnp.float32)

    # ----------------------------------------------------------------- forward
    def forward(self, seed_xyz, seed_features, proposals, scale_pred,
                ref_points, points_cat, aggregated_features):
        B, P, _ = proposals.shape
        R, SB, FSB = self.ray_num, self.sample_bin_num, self.fine_sample_bin_num

        # FPS + gather of target sample points
        fps_idx = farthest_point_sample(points_cat, self.fps_num_sample)
        target_sample_xyz = gather_points(points_cat, fps_idx)              # (B, S, 3)

        # 3-NN interpolation of the seed features onto the sampled points
        dist, idx3 = three_nn(target_sample_xyz, seed_xyz)
        dist_recip = 1.0 / (dist + 1e-8)
        norm = jnp.sum(dist_recip, axis=2, keepdims=True)
        weight = dist_recip / norm
        interpolated_features = three_interpolate(seed_features, idx3, weight)

        (coarse_ray_points, coarse_query_indices,
         coarse_query_sample_targets) = self._get_coarse_points(
            ref_points, scale_pred, target_sample_xyz)
        coarse_ray_points_flat = coarse_ray_points.reshape(B, -1, 3)

        interpolated_features = fused_mlp(interpolated_features, self.seed_feat_reduce)

        _, coarse_ray_features, _ = pointnet_sa_fused(
            target_sample_xyz, interpolated_features, coarse_ray_points_flat,
            self.sa_radius, self.sa_num_sample, self.coarse_sa_mlp)
        # coarse_ray_features: (B, red//2, P*SB*R)

        coarse_intersection_score = fused_intersection(
            aggregated_features, coarse_ray_features,
            self.coarse_intersection_module, R * SB)                        # (B, 2, P*R*SB)
        coarse_mask = jnp.argmax(coarse_intersection_score, axis=1).astype(jnp.int32)
        coarse_mask = coarse_mask.reshape(B, P, R * SB, 1)

        coarse_query_sample_targets = coarse_query_sample_targets * coarse_mask
        coarse_query_indices = (coarse_query_indices * coarse_mask).reshape(B, P, -1)

        # torch's pad-with-zero + gather(mask) == multiply by the {0,1} mask
        crf = coarse_ray_features.reshape(B, -1, P, SB * R)
        crf = crf * coarse_mask.reshape(B, 1, P, SB * R).astype(jnp.float32)
        crf = jnp.transpose(crf, (0, 1, 3, 2)).reshape(B, -1, R * P)
        crf = fused_mlp(crf, self.coarse_bin_reduce_dim)
        crf = crf.reshape(B, -1, P)
        coarse_ray_features_out = fused_mlp(crf, self.coarse_ray_reduce_dim)
        coarse_intersection_score = coarse_intersection_score.reshape(B, 2, P, R * SB)

        fine_ray_points, fine_query_indices = self._get_fine_points(
            ref_points, scale_pred, target_sample_xyz, coarse_query_sample_targets)
        fine_ray_points_flat = fine_ray_points.reshape(B, -1, 3)
        _, fine_ray_features, _ = pointnet_sa_fused(
            target_sample_xyz, interpolated_features, fine_ray_points_flat,
            self.fine_sa_radius, self.fine_sa_num_sample, self.fine_sa_mlp)
        # fine_ray_features: (B, red//2, P*FSB*R)

        fine_intersection_score = fused_intersection(
            aggregated_features, fine_ray_features,
            self.fine_intersection_module, R * FSB)                         # (B, 2, P*R*FSB)
        fine_mask = jnp.argmax(fine_intersection_score, axis=1).astype(jnp.int32)
        fine_mask = fine_mask.reshape(B, P, R * FSB, 1)

        fine_query_indices = (fine_query_indices * fine_mask).reshape(B, P, -1)

        frf = fine_ray_features.reshape(B, -1, P, FSB * R)
        frf = frf * fine_mask.reshape(B, 1, P, FSB * R).astype(jnp.float32)
        frf = jnp.transpose(frf, (0, 1, 3, 2)).reshape(B, -1, R * P)
        frf = fused_mlp(frf, self.fine_bin_reduce_dim)
        frf = frf.reshape(B, -1, P)
        fine_ray_features_out = fused_mlp(frf, self.fine_ray_reduce_dim)
        fine_intersection_score = fine_intersection_score.reshape(B, 2, P, FSB * R)

        fuse_ray_features = fused_mlp(
            jnp.concatenate([fine_ray_features_out, coarse_ray_features_out], axis=1),
            self.fuse_layer)

        return (fuse_ray_features, fine_intersection_score, fine_query_indices,
                coarse_intersection_score, coarse_query_indices)

    # --------------------------------------------------------- coarse sampling
    def _get_coarse_points(self, aggregation_points, scale_pred, points_xyz):
        B, P = scale_pred.shape[:2]
        R, SB = self.ray_num, self.sample_bin_num
        rv = self.ray_vector[None, None, :, :] * scale_pred[:, :, None, None]  # (B,P,R,3)
        bin_scale = jnp.array([bid / SB for bid in range(SB, 0, -1)], jnp.float32)
        rel = rv[:, :, None, :, :] * (self.scale_ratio * bin_scale)[None, None, :, None, None]
        rel = rel.reshape(B, P, SB * R, 3)
        coarse_sample_positions = rel + aggregation_points[:, :, None, :]
        flat = coarse_sample_positions.reshape(B, -1, 3)
        padded = jnp.concatenate(
            [jnp.full((B, 1, 3), 100.0, jnp.float32), points_xyz], axis=1)
        qidx, _ = ball_query(self.sa_radius, self.sa_num_sample, padded, flat)
        qidx = qidx.reshape(B, P, SB * R, self.sa_num_sample)
        # NOTE: indices reference the padded point array (dummy point at index 0),
        # matching the torch reference's downstream indexing convention.
        sum_idx = jnp.sum(qidx, axis=-1, keepdims=True)
        targets = (sum_idx > 0).astype(jnp.int32)
        return coarse_sample_positions, qidx, targets

    # ----------------------------------------------------------- fine sampling
    def _get_fine_points(self, aggregation_points, scale_pred, points_xyz,
                         coarse_query_sample_targets):
        B, P = scale_pred.shape[:2]
        R, SB, FSB = self.ray_num, self.sample_bin_num, self.fine_sample_bin_num
        rv = self.ray_vector[None, None, :, :] * scale_pred[:, :, None, None]
        padded = jnp.concatenate(
            [jnp.full((B, 1, 3), 100.0, jnp.float32), points_xyz], axis=1)

        targets = coarse_query_sample_targets.reshape(B, P, SB, R)
        coarse_weights = jnp.transpose(targets, (0, 1, 3, 2)).astype(jnp.float32) + 1e-5
        pdf = coarse_weights / jnp.sum(coarse_weights, axis=-1, keepdims=True)
        cdf = jnp.cumsum(pdf, axis=-1)
        cdf = jnp.concatenate([jnp.zeros_like(cdf[..., :1]), cdf], axis=-1)  # (B,P,R,SB+1)

        u = jnp.linspace(0.0 + 0.0001, 1.0 - 1e-5, FSB, dtype=jnp.float32)
        u = jnp.broadcast_to(u, cdf.shape[:-1] + (FSB,))

        # torch.searchsorted(cdf, u, right=True)
        inds = jnp.sum((cdf[..., None, :] <= u[..., :, None]).astype(jnp.int32), axis=-1)
        below = jnp.maximum(0, inds - 1)
        above = jnp.minimum(cdf.shape[-1] - 1, inds)

        cdf_g0 = jnp.take_along_axis(cdf, below, axis=-1)
        cdf_g1 = jnp.take_along_axis(cdf, above, axis=-1)

        bins = jnp.array(list(range(SB, 0, -1)) + [0], jnp.int32)
        bins_g1 = bins[above]
        bin_center = jnp.array([bid / SB for bid in range(1, SB + 1)], jnp.float32)
        bins_g_above = bin_center[bins_g1] + self.sa_radius
        bins_g_below = bin_center[bins_g1] - self.sa_radius

        denom = cdf_g1 - cdf_g0
        denom = jnp.where(denom < 1e-5, jnp.ones_like(denom), denom)
        t = (u - cdf_g0) / denom
        fine_samples = bins_g_above - t * (bins_g_above - bins_g_below)     # (B,P,R,FSB)
        fine_samples = jnp.transpose(fine_samples, (0, 1, 3, 2))            # (B,P,FSB,R)

        rel = rv[:, :, None, :, :] * self.scale_ratio * fine_samples[..., None]
        rel = rel.reshape(B, P, -1, 3)
        fine_sample_positions = aggregation_points[:, :, None, :] + rel     # (B,P,FSB*R,3)
        qidx, _ = ball_query(self.fine_sa_radius, self.fine_sa_num_sample, padded,
                             fine_sample_positions.reshape(B, -1, 3))
        qidx = qidx.reshape(B, P, FSB * R, self.fine_sa_num_sample)
        return fine_sample_positions, qidx


# ---------------------------------------------------------------------------
if __name__ == "__main__":
    cfg = dict(
        RAY_NUM=6,               # generate_ray(6) -> exactly 6 rays (4*n^2+2, n=1)
        SEED_FEAT_DIM=32,
        SAMPLE_BIN_NUM=4,
        SA_RADIUS=0.4,
        SCALE_RATIO=1.0,
        FPS_NUM_SAMPLE=16,
        SA_NUM_SAMPLE=4,
        FINE_SAMPLE_BIN_NUM=3,
        FINE_SA_RADIUS=0.2,
        FINE_SA_NUM_SAMPLE=4,
        NUM_SEED_POINTS=16,
    )
    model = RayBasedGroupingPallas(cfg, jax.random.PRNGKey(42))

    key = jax.random.PRNGKey(0)
    keys = jax.random.split(key, 7)
    B, P, Nseed, Npts = 2, 8, 32, 64
    seed_xyz = jax.random.uniform(keys[0], (B, Nseed, 3), minval=-1.0, maxval=1.0)
    seed_features = jax.random.normal(keys[1], (B, cfg['SEED_FEAT_DIM'], Nseed))
    proposals = jax.random.normal(keys[2], (B, P, 7))
    scale_pred = jax.random.uniform(keys[3], (B, P), minval=0.5, maxval=1.5)
    ref_points = jax.random.uniform(keys[4], (B, P, 3), minval=-1.0, maxval=1.0)
    points_cat = jax.random.uniform(keys[5], (B, Npts, 3), minval=-1.0, maxval=1.0)
    aggregated_features = jax.random.normal(keys[6], (B, cfg['SEED_FEAT_DIM'] // 2, P))

    fwd = jax.jit(model.forward)
    outs = fwd(seed_xyz, seed_features, proposals, scale_pred,
               ref_points, points_cat, aggregated_features)
    jax.block_until_ready(outs)
    print("KERNEL_OK")
</pallas_src>

<mosaic_0001>
module attributes {stable_mosaic.version = 11 : i64} {
  func.func private @main(%arg0: i32) attributes {dimension_semantics = [#tpu.dimension_semantics<core_parallel>], iteration_bounds = array<i64: 2>, tpu.core_type = #tpu.core_type<sc_scalar_subcore>, window_params = []} {
    return
  }
}

module attributes {stable_mosaic.version = 11 : i64} {
  func.func private @main(%arg0: i32) attributes {dimension_semantics = [#tpu.dimension_semantics<core_parallel>], iteration_bounds = array<i64: 2>, tpu.core_type = #tpu.core_type<sc_scalar_subcore>, window_params = []} {
    return
  }
}

module attributes {stable_mosaic.version = 11 : i64} {
  func.func @_fused_mlp_kernel(%arg0: i32, %arg1: memref<32x128xf32, #tpu.memory_space<vmem>>, %arg2: memref<16x32xf32, #tpu.memory_space<vmem>>, %arg3: memref<16x1xf32, #tpu.memory_space<vmem>>, %arg4: memref<8x16xf32, #tpu.memory_space<vmem>>, %arg5: memref<8x1xf32, #tpu.memory_space<vmem>>, %arg6: memref<8x128xf32, #tpu.memory_space<vmem>>) attributes {dimension_semantics = [#tpu.dimension_semantics<parallel>], iteration_bounds = array<i64: 1>, scalar_prefetch = 0 : i64, scratch_operands = 0 : i64, tpu.core_type = #tpu.core_type<tc>, window_params = [{transform_indices = @transform_0, window_bounds = array<i64: 32, 128>}, {pipeline_mode = #tpu.pipeline_mode<synchronous>, transform_indices = @transform_1, window_bounds = array<i64: 16, 32>}, {pipeline_mode = #tpu.pipeline_mode<synchronous>, transform_indices = @transform_2, window_bounds = array<i64: 16, 1>}, {pipeline_mode = #tpu.pipeline_mode<synchronous>, transform_indices = @transform_3, window_bounds = array<i64: 8, 16>}, {pipeline_mode = #tpu.pipeline_mode<synchronous>, transform_indices = @transform_4, window_bounds = array<i64: 8, 1>}, {transform_indices = @transform_5, window_bounds = array<i64: 8, 128>}]} {
    %c0 = arith.constant 0 : index
    %c0_0 = arith.constant 0 : index
    %0 = vector.load %arg1[%c0, %c0_0] : memref<32x128xf32, #tpu.memory_space<vmem>>, vector<32x128xf32>
    %c0_1 = arith.constant 0 : index
    %c0_2 = arith.constant 0 : index
    %1 = vector.load %arg2[%c0_1, %c0_2] : memref<16x32xf32, #tpu.memory_space<vmem>>, vector<16x32xf32>
    %c0_3 = arith.constant 0 : index
    %c0_4 = arith.constant 0 : index
    %2 = vector.load %arg3[%c0_3, %c0_4] : memref<16x1xf32, #tpu.memory_space<vmem>>, vector<16x1xf32>
    %cst = arith.constant dense<0.000000e+00> : vector<16x128xf32>
    %3 = tpu.matmul %1, %0, %cst {dimension_numbers = #tpu.dot_dimension_numbers<[1], [0], [0], [1], [0, 0, 1, 1], [], []>} : vector<16x32xf32>, vector<32x128xf32>, vector<16x128xf32> -> vector<16x128xf32>
    %4 = vector.broadcast %2 : vector<16x1xf32> to vector<16x128xf32>
    %5 = arith.addf %3, %4 : vector<16x128xf32>
    %cst_5 = arith.constant 0.000000e+00 : f32
    %6 = vector.broadcast %cst_5 : f32 to vector<16x128xf32>
    %7 = arith.maximumf %5, %6 : vector<16x128xf32>
    %c0_6 = arith.constant 0 : index
    %c0_7 = arith.constant 0 : index
    %8 = vector.load %arg4[%c0_6, %c0_7] : memref<8x16xf32, #tpu.memory_space<vmem>>, vector<8x16xf32>
    %c0_8 = arith.constant 0 : index
    %c0_9 = arith.constant 0 : index
    %9 = vector.load %arg5[%c0_8, %c0_9] : memref<8x1xf32, #tpu.memory_space<vmem>>, vector<8x1xf32>
    %cst_10 = arith.constant dense<0.000000e+00> : vector<8x128xf32>
    %10 = tpu.matmul %8, %7, %cst_10 {dimension_numbers = #tpu.dot_dimension_numbers<[1], [0], [0], [1], [0, 0, 1, 1], [], []>} : vector<8x16xf32>, vector<16x128xf32>, vector<8x128xf32> -> vector<8x128xf32>
    %11 = vector.broadcast %9 : vector<8x1xf32> to vector<8x128xf32>
    %12 = arith.addf %10, %11 : vector<8x128xf32>
    %c0_11 = arith.constant 0 : index
    %c0_12 = arith.constant 0 : index
    %13 = vector.load %arg6[%c0_11, %c0_12] : memref<8x128xf32, #tpu.memory_space<vmem>>, vector<8x128xf32>
    tpu.vector_store %arg6[%c0_11, %c0_12], %12 {strides = array<i32>} : memref<8x128xf32, #tpu.memory_space<vmem>>, vector<8x128xf32>,
    return
  }
  func.func @transform_0(%arg0: i32) -> (i32, i32) {
    %c0_i32 = arith.constant 0 : i32
    %c0_i32_0 = arith.constant 0 : i32
    return %c0_i32, %arg0 : i32, i32
  }
  func.func @transform_1(%arg0: i32) -> (i32, i32) {
    %c0_i32 = arith.constant 0 : i32
    %c0_i32_0 = arith.constant 0 : i32
    %c0_i32_1 = arith.constant 0 : i32
    return %c0_i32, %c0_i32_0 : i32, i32
  }
  func.func @transform_2(%arg0: i32) -> (i32, i32) {
    %c0_i32 = arith.constant 0 : i32
    %c0_i32_0 = arith.constant 0 : i32
    %c0_i32_1 = arith.constant 0 : i32
    return %c0_i32, %c0_i32_0 : i32, i32
  }
  func.func @transform_3(%arg0: i32) -> (i32, i32) {
    %c0_i32 = arith.constant 0 : i32
    %c0_i32_0 = arith.constant 0 : i32
    %c0_i32_1 = arith.constant 0 : i32
    return %c0_i32, %c0_i32_0 : i32, i32
  }
  func.func @transform_4(%arg0: i32) -> (i32, i32) {
    %c0_i32 = arith.constant 0 : i32
    %c0_i32_0 = arith.constant 0 : i32
    %c0_i32_1 = arith.constant 0 : i32
    return %c0_i32, %c0_i32_0 : i32, i32
  }
  func.func @transform_5(%arg0: i32) -> (i32, i32) {
    %c0_i32 = arith.constant 0 : i32
    %c0_i32_0 = arith.constant 0 : i32
    return %c0_i32, %arg0 : i32, i32
  }
}

module attributes {stable_mosaic.version = 11 : i64} {
  func.func @_sa_fused_kernel(%arg0: i32, %arg1: i32, %arg2: memref<1x4x16x256xf32, #tpu.memory_space<vmem>>, %arg3: memref<1x1x256xf32, #tpu.memory_space<vmem>>, %arg4: memref<8x16xf32, #tpu.memory_space<vmem>>, %arg5: memref<8x1xf32, #tpu.memory_space<vmem>>, %arg6: memref<8x8xf32, #tpu.memory_space<vmem>>, %arg7: memref<8x1xf32, #tpu.memory_space<vmem>>, %arg8: memref<1x8x256xf32, #tpu.memory_space<vmem>>) attributes {dimension_semantics = [#tpu.dimension_semantics<parallel>, #tpu.dimension_semantics<parallel>], iteration_bounds = array<i64: 2, 1>, scalar_prefetch = 0 : i64, scratch_operands = 0 : i64, tpu.core_type = #tpu.core_type<tc>, window_params = [{transform_indices = @transform_0, window_bounds = array<i64: 1, 4, 16, 256>}, {transform_indices = @transform_1, window_bounds = array<i64: 1, 1, 256>}, {pipeline_mode = #tpu.pipeline_mode<synchronous>, transform_indices = @transform_2, window_bounds = array<i64: 8, 16>}, {pipeline_mode = #tpu.pipeline_mode<synchronous>, transform_indices = @transform_3, window_bounds = array<i64: 8, 1>}, {pipeline_mode = #tpu.pipeline_mode<synchronous>, transform_indices = @transform_4, window_bounds = array<i64: 8, 8>}, {pipeline_mode = #tpu.pipeline_mode<synchronous>, transform_indices = @transform_5, window_bounds = array<i64: 8, 1>}, {transform_indices = @transform_6, window_bounds = array<i64: 1, 8, 256>}]} {
    %c0 = arith.constant 0 : index
    %c0_0 = arith.constant 0 : index
    %0 = vector.load %arg4[%c0, %c0_0] : memref<8x16xf32, #tpu.memory_space<vmem>>, vector<8x16xf32>
    %c0_1 = arith.constant 0 : index
    %c0_2 = arith.constant 0 : index
    %1 = vector.load %arg5[%c0_1, %c0_2] : memref<8x1xf32, #tpu.memory_space<vmem>>, vector<8x1xf32>
    %c0_3 = arith.constant 0 : index
    %c0_4 = arith.constant 0 : index
    %2 = vector.load %arg6[%c0_3, %c0_4] : memref<8x8xf32, #tpu.memory_space<vmem>>, vector<8x8xf32>
    %c0_5 = arith.constant 0 : index
    %c0_6 = arith.constant 0 : index
    %3 = vector.load %arg7[%c0_5, %c0_6] : memref<8x1xf32, #tpu.memory_space<vmem>>, vector<8x1xf32>
    %c0_7 = arith.constant 0 : index
    %c0_8 = arith.constant 0 : index
    %c0_9 = arith.constant 0 : index
    %c0_10 = arith.constant 0 : index
    %4 = vector.load %arg2[%c0_7, %c0_8, %c0_9, %c0_10] : memref<1x4x16x256xf32, #tpu.memory_space<vmem>>, vector<1x1x16x256xf32>
    %5 = vector.shape_cast %4 : vector<1x1x16x256xf32> to vector<16x256xf32>
    %cst = arith.constant dense<0.000000e+00> : vector<8x256xf32>
    %6 = tpu.matmul %0, %5, %cst {dimension_numbers = #tpu.dot_dimension_numbers<[1], [0], [0], [1], [0, 0, 1, 1], [], []>} : vector<8x16xf32>, vector<16x256xf32>, vector<8x256xf32> -> vector<8x256xf32>
    %7 = vector.broadcast %1 : vector<8x1xf32> to vector<8x256xf32>
    %8 = arith.addf %6, %7 : vector<8x256xf32>
    %cst_11 = arith.constant 0.000000e+00 : f32
    %9 = vector.broadcast %cst_11 : f32 to vector<8x256xf32>
    %10 = arith.maximumf %8, %9 : vector<8x256xf32>
    %cst_12 = arith.constant dense<0.000000e+00> : vector<8x256xf32>
    %11 = tpu.matmul %2, %10, %cst_12 {dimension_numbers = #tpu.dot_dimension_numbers<[1], [0], [0], [1], [0, 0, 1, 1], [], []>} : vector<8x8xf32>, vector<8x256xf32>, vector<8x256xf32> -> vector<8x256xf32>
    %12 = vector.broadcast %3 : vector<8x1xf32> to vector<8x256xf32>
    %13 = arith.addf %11, %12 : vector<8x256xf32>
    %cst_13 = arith.constant 0.000000e+00 : f32
    %14 = vector.broadcast %cst_13 : f32 to vector<8x256xf32>
    %15 = arith.maximumf %13, %14 : vector<8x256xf32>
    %c0_14 = arith.constant 0 : index
    %c1 = arith.constant 1 : index
    %c0_15 = arith.constant 0 : index
    %c0_16 = arith.constant 0 : index
    %16 = vector.load %arg2[%c0_14, %c1, %c0_15, %c0_16] : memref<1x4x16x256xf32, #tpu.memory_space<vmem>>, vector<1x1x16x256xf32>
    %17 = vector.shape_cast %16 : vector<1x1x16x256xf32> to vector<16x256xf32>
    %cst_17 = arith.constant dense<0.000000e+00> : vector<8x256xf32>
    %18 = tpu.matmul %0, %17, %cst_17 {dimension_numbers = #tpu.dot_dimension_numbers<[1], [0], [0], [1], [0, 0, 1, 1], [], []>} : vector<8x16xf32>, vector<16x256xf32>, vector<8x256xf32> -> vector<8x256xf32>
    %19 = vector.broadcast %1 : vector<8x1xf32> to vector<8x256xf32>
    %20 = arith.addf %18, %19 : vector<8x256xf32>
    %cst_18 = arith.constant 0.000000e+00 : f32
    %21 = vector.broadcast %cst_18 : f32 to vector<8x256xf32>
    %22 = arith.maximumf %20, %21 : vector<8x256xf32>
    %cst_19 = arith.constant dense<0.000000e+00> : vector<8x256xf32>
    %23 = tpu.matmul %2, %22, %cst_19 {dimension_numbers = #tpu.dot_dimension_numbers<[1], [0], [0], [1], [0, 0, 1, 1], [], []>} : vector<8x8xf32>, vector<8x256xf32>, vector<8x256xf32> -> vector<8x256xf32>
    %24 = vector.broadcast %3 : vector<8x1xf32> to vector<8x256xf32>
    %25 = arith.addf %23, %24 : vector<8x256xf32>
    %cst_20 = arith.constant 0.000000e+00 : f32
    %26 = vector.broadcast %cst_20 : f32 to vector<8x256xf32>
    %27 = arith.maximumf %25, %26 : vector<8x256xf32>
    %28 = arith.maximumf %15, %27 : vector<8x256xf32>
    %c0_21 = arith.constant 0 : index
    %c2 = arith.constant 2 : index
    %c0_22 = arith.constant 0 : index
    %c0_23 = arith.constant 0 : index
    %29 = vector.load %arg2[%c0_21, %c2, %c0_22, %c0_23] : memref<1x4x16x256xf32, #tpu.memory_space<vmem>>, vector<1x1x16x256xf32>
    %30 = vector.shape_cast %29 : vector<1x1x16x256xf32> to vector<16x256xf32>
    %cst_24 = arith.constant dense<0.000000e+00> : vector<8x256xf32>
    %31 = tpu.matmul %0, %30, %cst_24 {dimension_numbers = #tpu.dot_dimension_numbers<[1], [0], [0], [1], [0, 0, 1, 1], [], []>} : vector<8x16xf32>, vector<16x256xf32>, vector<8x256xf32> -> vector<8x256xf32>
    %32 = vector.broadcast %1 : vector<8x1xf32> to vector<8x256xf32>
    %33 = arith.addf %31, %32 : vector<8x256xf32>
    %cst_25 = arith.constant 0.000000e+00 : f32
    %34 = vector.broadcast %cst_25 : f32 to vector<8x256xf32>
    %35 = arith.maximumf %33, %34 : vector<8x256xf32>
    %cst_26 = arith.constant dense<0.000000e+00> : vector<8x256xf32>
    %36 = tpu.matmul %2, %35, %cst_26 {dimension_numbers = #tpu.dot_dimension_numbers<[1], [0], [0], [1], [0, 0, 1, 1], [], []>} : vector<8x8xf32>, vector<8x256xf32>, vector<8x256xf32> -> vector<8x256xf32>
    %37 = vector.broadcast %3 : vector<8x1xf32> to vector<8x256xf32>
    %38 = arith.addf %36, %37 : vector<8x256xf32>
    %cst_27 = arith.constant 0.000000e+00 : f32
    %39 = vector.broadcast %cst_27 : f32 to vector<8x256xf32>
    %40 = arith.maximumf %38, %39 : vector<8x256xf32>
    %41 = arith.maximumf %28, %40 : vector<8x256xf32>
    %c0_28 = arith.constant 0 : index
    %c3 = arith.constant 3 : index
    %c0_29 = arith.constant 0 : index
    %c0_30 = arith.constant 0 : index
    %42 = vector.load %arg2[%c0_28, %c3, %c0_29, %c0_30] : memref<1x4x16x256xf32, #tpu.memory_space<vmem>>, vector<1x1x16x256xf32>
    %43 = vector.shape_cast %42 : vector<1x1x16x256xf32> to vector<16x256xf32>
    %cst_31 = arith.constant dense<0.000000e+00> : vector<8x256xf32>
    %44 = tpu.matmul %0, %43, %cst_31 {dimension_numbers = #tpu.dot_dimension_numbers<[1], [0], [0], [1], [0, 0, 1, 1], [], []>} : vector<8x16xf32>, vector<16x256xf32>, vector<8x256xf32> -> vector<8x256xf32>
    %45 = vector.broadcast %1 : vector<8x1xf32> to vector<8x256xf32>
    %46 = arith.addf %44, %45 : vector<8x256xf32>
    %cst_32 = arith.constant 0.000000e+00 : f32
    %47 = vector.broadcast %cst_32 : f32 to vector<8x256xf32>
    %48 = arith.maximumf %46, %47 : vector<8x256xf32>
    %cst_33 = arith.constant dense<0.000000e+00> : vector<8x256xf32>
    %49 = tpu.matmul %2, %48, %cst_33 {dimension_numbers = #tpu.dot_dimension_numbers<[1], [0], [0], [1], [0, 0, 1, 1], [], []>} : vector<8x8xf32>, vector<8x256xf32>, vector<8x256xf32> -> vector<8x256xf32>
    %50 = vector.broadcast %3 : vector<8x1xf32> to vector<8x256xf32>
    %51 = arith.addf %49, %50 : vector<8x256xf32>
    %cst_34 = arith.constant 0.000000e+00 : f32
    %52 = vector.broadcast %cst_34 : f32 to vector<8x256xf32>
    %53 = arith.maximumf %51, %52 : vector<8x256xf32>
    %54 = arith.maximumf %41, %53 : vector<8x256xf32>
    %c0_35 = arith.constant 0 : index
    %c0_36 = arith.constant 0 : index
    %c0_37 = arith.constant 0 : index
    %55 = vector.load %arg3[%c0_35, %c0_36, %c0_37] : memref<1x1x256xf32, #tpu.memory_space<vmem>>, vector<1x1x256xf32>
    %56 = vector.shape_cast %55 : vector<1x1x256xf32> to vector<1x256xf32>
    %cst_38 = arith.constant 0.000000e+00 : f32
    %57 = vector.broadcast %cst_38 : f32 to vector<1x256xf32>
    %58 = arith.cmpf ogt, %56, %57 : vector<1x256xf32>
    %cst_39 = arith.constant 0.000000e+00 : f32
    %59 = vector.shape_cast %58 : vector<1x256xi1> to vector<1x256xi1>
    %60 = vector.broadcast %59 : vector<1x256xi1> to vector<8x256xi1>
    %61 = vector.broadcast %cst_39 : f32 to vector<8x256xf32>
    %62 = arith.select %60, %54, %61 : vector<8x256xi1>, vector<8x256xf32>
    %c0_40 = arith.constant 0 : index
    %c0_41 = arith.constant 0 : index
    %c0_42 = arith.constant 0 : index
    %63 = vector.load %arg8[%c0_40, %c0_41, %c0_42] : memref<1x8x256xf32, #tpu.memory_space<vmem>>, vector<1x8x256xf32>
    %64 = vector.shape_cast %63 : vector<1x8x256xf32> to vector<8x256xf32>
    %65 = vector.shape_cast %62 : vector<8x256xf32> to vector<1x8x256xf32>
    tpu.vector_store %arg8[%c0_40, %c0_41, %c0_42], %65 {strides = array<i32>} : memref<1x8x256xf32, #tpu.memory_space<vmem>>, vector<1x8x256xf32>,
    return
  }
  func.func @transform_0(%arg0: i32, %arg1: i32) -> (i32, i32, i32, i32) {
    %c0_i32 = arith.constant 0 : i32
    %c0_i32_0 = arith.constant 0 : i32
    %c0_i32_1 = arith.constant 0 : i32
    return %arg0, %c0_i32, %c0_i32_0, %arg1 : i32, i32, i32, i32
  }
  func.func @transform_1(%arg0: i32, %arg1: i32) -> (i32, i32, i32) {
    %c0_i32 = arith.constant 0 : i32
    %c0_i32_0 = arith.constant 0 : i32
    return %arg0, %c0_i32, %arg1 : i32, i32, i32
  }
  func.func @transform_2(%arg0: i32, %arg1: i32) -> (i32, i32) {
    %c0_i32 = arith.constant 0 : i32
    %c0_i32_0 = arith.constant 0 : i32
    %c0_i32_1 = arith.constant 0 : i32
    return %c0_i32, %c0_i32_0 : i32, i32
  }
  func.func @transform_3(%arg0: i32, %arg1: i32) -> (i32, i32) {
    %c0_i32 = arith.constant 0 : i32
    %c0_i32_0 = arith.constant 0 : i32
    %c0_i32_1 = arith.constant 0 : i32
    return %c0_i32, %c0_i32_0 : i32, i32
  }
  func.func @transform_4(%arg0: i32, %arg1: i32) -> (i32, i32) {
    %c0_i32 = arith.constant 0 : i32
    %c0_i32_0 = arith.constant 0 : i32
    %c0_i32_1 = arith.constant 0 : i32
    return %c0_i32, %c0_i32_0 : i32, i32
  }
  func.func @transform_5(%arg0: i32, %arg1: i32) -> (i32, i32) {
    %c0_i32 = arith.constant 0 : i32
    %c0_i32_0 = arith.constant 0 : i32
    %c0_i32_1 = arith.constant 0 : i32
    return %c0_i32, %c0_i32_0 : i32, i32
  }
  func.func @transform_6(%arg0: i32, %arg1: i32) -> (i32, i32, i32) {
    %c0_i32 = arith.constant 0 : i32
    %c0_i32_0 = arith.constant 0 : i32
    return %arg0, %c0_i32, %arg1 : i32, i32, i32
  }
}

module attributes {stable_mosaic.version = 11 : i64} {
  func.func @_intersection_kernel(%arg0: i32, %arg1: memref<8x384xf32, #tpu.memory_space<vmem>>, %arg2: memref<16x384xf32, #tpu.memory_space<vmem>>, %arg3: memref<16x16xf32, #tpu.memory_space<vmem>>, %arg4: memref<8x16xf32, #tpu.memory_space<vmem>>, %arg5: memref<8x8xf32, #tpu.memory_space<vmem>>, %arg6: memref<8x1xf32, #tpu.memory_space<vmem>>, %arg7: memref<8x8xf32, #tpu.memory_space<vmem>>, %arg8: memref<8x1xf32, #tpu.memory_space<vmem>>, %arg9: memref<8x384xf32, #tpu.memory_space<vmem>>) attributes {dimension_semantics = [#tpu.dimension_semantics<parallel>], iteration_bounds = array<i64: 1>, scalar_prefetch = 0 : i64, scratch_operands = 0 : i64, tpu.core_type = #tpu.core_type<tc>, window_params = [{transform_indices = @transform_0, window_bounds = array<i64: 8, 384>}, {transform_indices = @transform_1, window_bounds = array<i64: 16, 384>}, {pipeline_mode = #tpu.pipeline_mode<synchronous>, transform_indices = @transform_2, window_bounds = array<i64: 16, 16>}, {pipeline_mode = #tpu.pipeline_mode<synchronous>, transform_indices = @transform_3, window_bounds = array<i64: 8, 16>}, {pipeline_mode = #tpu.pipeline_mode<synchronous>, transform_indices = @transform_4, window_bounds = array<i64: 8, 8>}, {pipeline_mode = #tpu.pipeline_mode<synchronous>, transform_indices = @transform_5, window_bounds = array<i64: 8, 1>}, {pipeline_mode = #tpu.pipeline_mode<synchronous>, transform_indices = @transform_6, window_bounds = array<i64: 8, 8>}, {pipeline_mode = #tpu.pipeline_mode<synchronous>, transform_indices = @transform_7, window_bounds = array<i64: 8, 1>}, {transform_indices = @transform_8, window_bounds = array<i64: 8, 384>}]} {
    %c0 = arith.constant 0 : index
    %c0_0 = arith.constant 0 : index
    %0 = vector.load %arg4[%c0, %c0_0] : memref<8x16xf32, #tpu.memory_space<vmem>>, vector<8x16xf32>
    %c0_1 = arith.constant 0 : index
    %c0_2 = arith.constant 0 : index
    %1 = vector.load %arg3[%c0_1, %c0_2] : memref<16x16xf32, #tpu.memory_space<vmem>>, vector<16x16xf32>
    %cst = arith.constant dense<0.000000e+00> : vector<8x16xf32>
    %2 = tpu.matmul %0, %1, %cst {dimension_numbers = #tpu.dot_dimension_numbers<[1], [0], [0], [1], [0, 0, 1, 1], [], []>} : vector<8x16xf32>, vector<16x16xf32>, vector<8x16xf32> -> vector<8x16xf32>
    %c0_3 = arith.constant 0 : index
    %c0_4 = arith.constant 0 : index
    %3 = vector.load %arg6[%c0_3, %c0_4] : memref<8x1xf32, #tpu.memory_space<vmem>>, vector<8x1xf32>
    %4 = vector.broadcast %3 : vector<8x1xf32> to vector<8x16xf32>
    %5 = arith.addf %2, %4 : vector<8x16xf32>
    %c0_5 = arith.constant 0 : index
    %c0_6 = arith.constant 0 : index
    %6 = vector.load %arg2[%c0_5, %c0_6] : memref<16x384xf32, #tpu.memory_space<vmem>>, vector<16x384xf32>
    %cst_7 = arith.constant dense<0.000000e+00> : vector<8x384xf32>
    %7 = tpu.matmul %5, %6, %cst_7 {dimension_numbers = #tpu.dot_dimension_numbers<[1], [0], [0], [1], [0, 0, 1, 1], [], []>} : vector<8x16xf32>, vector<16x384xf32>, vector<8x384xf32> -> vector<8x384xf32>
    %c0_8 = arith.constant 0 : index
    %c0_9 = arith.constant 0 : index
    %8 = vector.load %arg5[%c0_8, %c0_9] : memref<8x8xf32, #tpu.memory_space<vmem>>, vector<8x8xf32>
    %c0_10 = arith.constant 0 : index
    %c0_11 = arith.constant 0 : index
    %9 = vector.load %arg1[%c0_10, %c0_11] : memref<8x384xf32, #tpu.memory_space<vmem>>, vector<8x384xf32>
    %cst_12 = arith.constant dense<0.000000e+00> : vector<8x384xf32>
    %10 = tpu.matmul %8, %9, %cst_12 {dimension_numbers = #tpu.dot_dimension_numbers<[1], [0], [0], [1], [0, 0, 1, 1], [], []>} : vector<8x8xf32>, vector<8x384xf32>, vector<8x384xf32> -> vector<8x384xf32>
    %11 = arith.addf %7, %10 : vector<8x384xf32>
    %cst_13 = arith.constant 0.000000e+00 : f32
    %12 = vector.broadcast %cst_13 : f32 to vector<8x384xf32>
    %13 = arith.maximumf %11, %12 : vector<8x384xf32>
    %c0_14 = arith.constant 0 : index
    %c0_15 = arith.constant 0 : index
    %14 = vector.load %arg7[%c0_14, %c0_15] : memref<8x8xf32, #tpu.memory_space<vmem>>, vector<8x8xf32>
    %cst_16 = arith.constant dense<0.000000e+00> : vector<8x384xf32>
    %15 = tpu.matmul %14, %13, %cst_16 {dimension_numbers = #tpu.dot_dimension_numbers<[1], [0], [0], [1], [0, 0, 1, 1], [], []>} : vector<8x8xf32>, vector<8x384xf32>, vector<8x384xf32> -> vector<8x384xf32>
    %c0_17 = arith.constant 0 : index
    %c0_18 = arith.constant 0 : index
    %16 = vector.load %arg8[%c0_17, %c0_18] : memref<8x1xf32, #tpu.memory_space<vmem>>, vector<8x1xf32>
    %17 = vector.broadcast %16 : vector<8x1xf32> to vector<8x384xf32>
    %18 = arith.addf %15, %17 : vector<8x384xf32>
    %c0_19 = arith.constant 0 : index
    %c0_20 = arith.constant 0 : index
    %19 = vector.load %arg9[%c0_19, %c0_20] : memref<8x384xf32, #tpu.memory_space<vmem>>, vector<8x384xf32>
    tpu.vector_store %arg9[%c0_19, %c0_20], %18 {strides = array<i32>} : memref<8x384xf32, #tpu.memory_space<vmem>>, vector<8x384xf32>,
    return
  }
  func.func @transform_0(%arg0: i32) -> (i32, i32) {
    %c0_i32 = arith.constant 0 : i32
    %c0_i32_0 = arith.constant 0 : i32
    return %c0_i32, %arg0 : i32, i32
  }
  func.func @transform_1(%arg0: i32) -> (i32, i32) {
    %c0_i32 = arith.constant 0 : i32
    %c0_i32_0 = arith.constant 0 : i32
    return %c0_i32, %arg0 : i32, i32
  }
  func.func @transform_2(%arg0: i32) -> (i32, i32) {
    %c0_i32 = arith.constant 0 : i32
    %c0_i32_0 = arith.constant 0 : i32
    %c0_i32_1 = arith.constant 0 : i32
    return %c0_i32, %c0_i32_0 : i32, i32
  }
  func.func @transform_3(%arg0: i32) -> (i32, i32) {
    %c0_i32 = arith.constant 0 : i32
    %c0_i32_0 = arith.constant 0 : i32
    %c0_i32_1 = arith.constant 0 : i32
    return %c0_i32, %c0_i32_0 : i32, i32
  }
  func.func @transform_4(%arg0: i32) -> (i32, i32) {
    %c0_i32 = arith.constant 0 : i32
    %c0_i32_0 = arith.constant 0 : i32
    %c0_i32_1 = arith.constant 0 : i32
    return %c0_i32, %c0_i32_0 : i32, i32
  }
  func.func @transform_5(%arg0: i32) -> (i32, i32) {
    %c0_i32 = arith.constant 0 : i32
    %c0_i32_0 = arith.constant 0 : i32
    %c0_i32_1 = arith.constant 0 : i32
    return %c0_i32, %c0_i32_0 : i32, i32
  }
  func.func @transform_6(%arg0: i32) -> (i32, i32) {
    %c0_i32 = arith.constant 0 : i32
    %c0_i32_0 = arith.constant 0 : i32
    %c0_i32_1 = arith.constant 0 : i32
    return %c0_i32, %c0_i32_0 : i32, i32
  }
  func.func @transform_7(%arg0: i32) -> (i32, i32) {
    %c0_i32 = arith.constant 0 : i32
    %c0_i32_0 = arith.constant 0 : i32
    %c0_i32_1 = arith.constant 0 : i32
    return %c0_i32, %c0_i32_0 : i32, i32
  }
  func.func @transform_8(%arg0: i32) -> (i32, i32) {
    %c0_i32 = arith.constant 0 : i32
    %c0_i32_0 = arith.constant 0 : i32
    return %c0_i32, %arg0 : i32, i32
  }
}

module attributes {stable_mosaic.version = 11 : i64} {
  func.func @_fused_mlp_kernel(%arg0: i32, %arg1: memref<16x128xf32, #tpu.memory_space<vmem>>, %arg2: memref<8x16xf32, #tpu.memory_space<vmem>>, %arg3: memref<8x1xf32, #tpu.memory_space<vmem>>, %arg4: memref<8x128xf32, #tpu.memory_space<vmem>>) attributes {dimension_semantics = [#tpu.dimension_semantics<parallel>], iteration_bounds = array<i64: 1>, scalar_prefetch = 0 : i64, scratch_operands = 0 : i64, tpu.core_type = #tpu.core_type<tc>, window_params = [{transform_indices = @transform_0, window_bounds = array<i64: 16, 128>}, {pipeline_mode = #tpu.pipeline_mode<synchronous>, transform_indices = @transform_1, window_bounds = array<i64: 8, 16>}, {pipeline_mode = #tpu.pipeline_mode<synchronous>, transform_indices = @transform_2, window_bounds = array<i64: 8, 1>}, {transform_indices = @transform_3, window_bounds = array<i64: 8, 128>}]} {
    %c0 = arith.constant 0 : index
    %c0_0 = arith.constant 0 : index
    %0 = vector.load %arg1[%c0, %c0_0] : memref<16x128xf32, #tpu.memory_space<vmem>>, vector<16x128xf32>
    %c0_1 = arith.constant 0 : index
    %c0_2 = arith.constant 0 : index
    %1 = vector.load %arg2[%c0_1, %c0_2] : memref<8x16xf32, #tpu.memory_space<vmem>>, vector<8x16xf32>
    %c0_3 = arith.constant 0 : index
    %c0_4 = arith.constant 0 : index
    %2 = vector.load %arg3[%c0_3, %c0_4] : memref<8x1xf32, #tpu.memory_space<vmem>>, vector<8x1xf32>
    %cst = arith.constant dense<0.000000e+00> : vector<8x128xf32>
    %3 = tpu.matmul %1, %0, %cst {dimension_numbers = #tpu.dot_dimension_numbers<[1], [0], [0], [1], [0, 0, 1, 1], [], []>} : vector<8x16xf32>, vector<16x128xf32>, vector<8x128xf32> -> vector<8x128xf32>
    %4 = vector.broadcast %2 : vector<8x1xf32> to vector<8x128xf32>
    %5 = arith.addf %3, %4 : vector<8x128xf32>
    %c0_5 = arith.constant 0 : index
    %c0_6 = arith.constant 0 : index
    %6 = vector.load %arg4[%c0_5, %c0_6] : memref<8x128xf32, #tpu.memory_space<vmem>>, vector<8x128xf32>
    tpu.vector_store %arg4[%c0_5, %c0_6], %5 {strides = array<i32>} : memref<8x128xf32, #tpu.memory_space<vmem>>, vector<8x128xf32>,
    return
  }
  func.func @transform_0(%arg0: i32) -> (i32, i32) {
    %c0_i32 = arith.constant 0 : i32
    %c0_i32_0 = arith.constant 0 : i32
    return %c0_i32, %arg0 : i32, i32
  }
  func.func @transform_1(%arg0: i32) -> (i32, i32) {
    %c0_i32 = arith.constant 0 : i32
    %c0_i32_0 = arith.constant 0 : i32
    %c0_i32_1 = arith.constant 0 : i32
    return %c0_i32, %c0_i32_0 : i32, i32
  }
  func.func @transform_2(%arg0: i32) -> (i32, i32) {
    %c0_i32 = arith.constant 0 : i32
    %c0_i32_0 = arith.constant 0 : i32
    %c0_i32_1 = arith.constant 0 : i32
    return %c0_i32, %c0_i32_0 : i32, i32
  }
  func.func @transform_3(%arg0: i32) -> (i32, i32) {
    %c0_i32 = arith.constant 0 : i32
    %c0_i32_0 = arith.constant 0 : i32
    return %c0_i32, %arg0 : i32, i32
  }
}

module attributes {stable_mosaic.version = 11 : i64} {
  func.func @_fused_mlp_kernel(%arg0: i32, %arg1: memref<24x128xf32, #tpu.memory_space<vmem>>, %arg2: memref<32x24xf32, #tpu.memory_space<vmem>>, %arg3: memref<32x1xf32, #tpu.memory_space<vmem>>, %arg4: memref<16x32xf32, #tpu.memory_space<vmem>>, %arg5: memref<16x1xf32, #tpu.memory_space<vmem>>, %arg6: memref<16x128xf32, #tpu.memory_space<vmem>>) attributes {dimension_semantics = [#tpu.dimension_semantics<parallel>], iteration_bounds = array<i64: 1>, scalar_prefetch = 0 : i64, scratch_operands = 0 : i64, tpu.core_type = #tpu.core_type<tc>, window_params = [{transform_indices = @transform_0, window_bounds = array<i64: 24, 128>}, {pipeline_mode = #tpu.pipeline_mode<synchronous>, transform_indices = @transform_1, window_bounds = array<i64: 32, 24>}, {pipeline_mode = #tpu.pipeline_mode<synchronous>, transform_indices = @transform_2, window_bounds = array<i64: 32, 1>}, {pipeline_mode = #tpu.pipeline_mode<synchronous>, transform_indices = @transform_3, window_bounds = array<i64: 16, 32>}, {pipeline_mode = #tpu.pipeline_mode<synchronous>, transform_indices = @transform_4, window_bounds = array<i64: 16, 1>}, {transform_indices = @transform_5, window_bounds = array<i64: 16, 128>}]} {
    %c0 = arith.constant 0 : index
    %c0_0 = arith.constant 0 : index
    %0 = vector.load %arg1[%c0, %c0_0] : memref<24x128xf32, #tpu.memory_space<vmem>>, vector<24x128xf32>
    %c0_1 = arith.constant 0 : index
    %c0_2 = arith.constant 0 : index
    %1 = vector.load %arg2[%c0_1, %c0_2] : memref<32x24xf32, #tpu.memory_space<vmem>>, vector<32x24xf32>
    %c0_3 = arith.constant 0 : index
    %c0_4 = arith.constant 0 : index
    %2 = vector.load %arg3[%c0_3, %c0_4] : memref<32x1xf32, #tpu.memory_space<vmem>>, vector<32x1xf32>
    %cst = arith.constant dense<0.000000e+00> : vector<32x128xf32>
    %3 = tpu.matmul %1, %0, %cst {dimension_numbers = #tpu.dot_dimension_numbers<[1], [0], [0], [1], [0, 0, 1, 1], [], []>} : vector<32x24xf32>, vector<24x128xf32>, vector<32x128xf32> -> vector<32x128xf32>
    %4 = vector.broadcast %2 : vector<32x1xf32> to vector<32x128xf32>
    %5 = arith.addf %3, %4 : vector<32x128xf32>
    %cst_5 = arith.constant 0.000000e+00 : f32
    %6 = vector.broadcast %cst_5 : f32 to vector<32x128xf32>
    %7 = arith.maximumf %5, %6 : vector<32x128xf32>
    %c0_6 = arith.constant 0 : index
    %c0_7 = arith.constant 0 : index
    %8 = vector.load %arg4[%c0_6, %c0_7] : memref<16x32xf32, #tpu.memory_space<vmem>>, vector<16x32xf32>
    %c0_8 = arith.constant 0 : index
    %c0_9 = arith.constant 0 : index
    %9 = vector.load %arg5[%c0_8, %c0_9] : memref<16x1xf32, #tpu.memory_space<vmem>>, vector<16x1xf32>
    %cst_10 = arith.constant dense<0.000000e+00> : vector<16x128xf32>
    %10 = tpu.matmul %8, %7, %cst_10 {dimension_numbers = #tpu.dot_dimension_numbers<[1], [0], [0], [1], [0, 0, 1, 1], [], []>} : vector<16x32xf32>, vector<32x128xf32>, vector<16x128xf32> -> vector<16x128xf32>
    %11 = vector.broadcast %9 : vector<16x1xf32> to vector<16x128xf32>
    %12 = arith.addf %10, %11 : vector<16x128xf32>
    %c0_11 = arith.constant 0 : index
    %c0_12 = arith.constant 0 : index
    %13 = vector.load %arg6[%c0_11, %c0_12] : memref<16x128xf32, #tpu.memory_space<vmem>>, vector<16x128xf32>
    tpu.vector_store %arg6[%c0_11, %c0_12], %12 {strides = array<i32>} : memref<16x128xf32, #tpu.memory_space<vmem>>, vector<16x128xf32>,
    return
  }
  func.func @transform_0(%arg0: i32) -> (i32, i32) {
    %c0_i32 = arith.constant 0 : i32
    %c0_i32_0 = arith.constant 0 : i32
    return %c0_i32, %arg0 : i32, i32
  }
  func.func @transform_1(%arg0: i32) -> (i32, i32) {
    %c0_i32 = arith.constant 0 : i32
    %c0_i32_0 = arith.constant 0 : i32
    %c0_i32_1 = arith.constant 0 : i32
    return %c0_i32, %c0_i32_0 : i32, i32
  }
  func.func @transform_2(%arg0: i32) -> (i32, i32) {
    %c0_i32 = arith.constant 0 : i32
    %c0_i32_0 = arith.constant 0 : i32
    %c0_i32_1 = arith.constant 0 : i32
    return %c0_i32, %c0_i32_0 : i32, i32
  }
  func.func @transform_3(%arg0: i32) -> (i32, i32) {
    %c0_i32 = arith.constant 0 : i32
    %c0_i32_0 = arith.constant 0 : i32
    %c0_i32_1 = arith.constant 0 : i32
    return %c0_i32, %c0_i32_0 : i32, i32
  }
  func.func @transform_4(%arg0: i32) -> (i32, i32) {
    %c0_i32 = arith.constant 0 : i32
    %c0_i32_0 = arith.constant 0 : i32
    %c0_i32_1 = arith.constant 0 : i32
    return %c0_i32, %c0_i32_0 : i32, i32
  }
  func.func @transform_5(%arg0: i32) -> (i32, i32) {
    %c0_i32 = arith.constant 0 : i32
    %c0_i32_0 = arith.constant 0 : i32
    return %c0_i32, %arg0 : i32, i32
  }
}

module attributes {stable_mosaic.version = 11 : i64} {
  func.func @_fused_mlp_kernel(%arg0: i32, %arg1: memref<32x128xf32, #tpu.memory_space<vmem>>, %arg2: memref<32x32xf32, #tpu.memory_space<vmem>>, %arg3: memref<32x1xf32, #tpu.memory_space<vmem>>, %arg4: memref<16x32xf32, #tpu.memory_space<vmem>>, %arg5: memref<16x1xf32, #tpu.memory_space<vmem>>, %arg6: memref<16x128xf32, #tpu.memory_space<vmem>>) attributes {dimension_semantics = [#tpu.dimension_semantics<parallel>], iteration_bounds = array<i64: 1>, scalar_prefetch = 0 : i64, scratch_operands = 0 : i64, tpu.core_type = #tpu.core_type<tc>, window_params = [{transform_indices = @transform_0, window_bounds = array<i64: 32, 128>}, {pipeline_mode = #tpu.pipeline_mode<synchronous>, transform_indices = @transform_1, window_bounds = array<i64: 32, 32>}, {pipeline_mode = #tpu.pipeline_mode<synchronous>, transform_indices = @transform_2, window_bounds = array<i64: 32, 1>}, {pipeline_mode = #tpu.pipeline_mode<synchronous>, transform_indices = @transform_3, window_bounds = array<i64: 16, 32>}, {pipeline_mode = #tpu.pipeline_mode<synchronous>, transform_indices = @transform_4, window_bounds = array<i64: 16, 1>}, {transform_indices = @transform_5, window_bounds = array<i64: 16, 128>}]} {
    %c0 = arith.constant 0 : index
    %c0_0 = arith.constant 0 : index
    %0 = vector.load %arg1[%c0, %c0_0] : memref<32x128xf32, #tpu.memory_space<vmem>>, vector<32x128xf32>
    %c0_1 = arith.constant 0 : index
    %c0_2 = arith.constant 0 : index
    %1 = vector.load %arg2[%c0_1, %c0_2] : memref<32x32xf32, #tpu.memory_space<vmem>>, vector<32x32xf32>
    %c0_3 = arith.constant 0 : index
    %c0_4 = arith.constant 0 : index
    %2 = vector.load %arg3[%c0_3, %c0_4] : memref<32x1xf32, #tpu.memory_space<vmem>>, vector<32x1xf32>
    %cst = arith.constant dense<0.000000e+00> : vector<32x128xf32>
    %3 = tpu.matmul %1, %0, %cst {dimension_numbers = #tpu.dot_dimension_numbers<[1], [0], [0], [1], [0, 0, 1, 1], [], []>} : vector<32x32xf32>, vector<32x128xf32>, vector<32x128xf32> -> vector<32x128xf32>
    %4 = vector.broadcast %2 : vector<32x1xf32> to vector<32x128xf32>
    %5 = arith.addf %3, %4 : vector<32x128xf32>
    %cst_5 = arith.constant 0.000000e+00 : f32
    %6 = vector.broadcast %cst_5 : f32 to vector<32x128xf32>
    %7 = arith.maximumf %5, %6 : vector<32x128xf32>
    %c0_6 = arith.constant 0 : index
    %c0_7 = arith.constant 0 : index
    %8 = vector.load %arg4[%c0_6, %c0_7] : memref<16x32xf32, #tpu.memory_space<vmem>>, vector<16x32xf32>
    %c0_8 = arith.constant 0 : index
    %c0_9 = arith.constant 0 : index
    %9 = vector.load %arg5[%c0_8, %c0_9] : memref<16x1xf32, #tpu.memory_space<vmem>>, vector<16x1xf32>
    %cst_10 = arith.constant dense<0.000000e+00> : vector<16x128xf32>
    %10 = tpu.matmul %8, %7, %cst_10 {dimension_numbers = #tpu.dot_dimension_numbers<[1], [0], [0], [1], [0, 0, 1, 1], [], []>} : vector<16x32xf32>, vector<32x128xf32>, vector<16x128xf32> -> vector<16x128xf32>
    %11 = vector.broadcast %9 : vector<16x1xf32> to vector<16x128xf32>
    %12 = arith.addf %10, %11 : vector<16x128xf32>
    %c0_11 = arith.constant 0 : index
    %c0_12 = arith.constant 0 : index
    %13 = vector.load %arg6[%c0_11, %c0_12] : memref<16x128xf32, #tpu.memory_space<vmem>>, vector<16x128xf32>
    tpu.vector_store %arg6[%c0_11, %c0_12], %12 {strides = array<i32>} : memref<16x128xf32, #tpu.memory_space<vmem>>, vector<16x128xf32>,
    return
  }
  func.func @transform_0(%arg0: i32) -> (i32, i32) {
    %c0_i32 = arith.constant 0 : i32
    %c0_i32_0 = arith.constant 0 : i32
    return %c0_i32, %arg0 : i32, i32
  }
  func.func @transform_1(%arg0: i32) -> (i32, i32) {
    %c0_i32 = arith.constant 0 : i32
    %c0_i32_0 = arith.constant 0 : i32
    %c0_i32_1 = arith.constant 0 : i32
    return %c0_i32, %c0_i32_0 : i32, i32
  }
  func.func @transform_2(%arg0: i32) -> (i32, i32) {
    %c0_i32 = arith.constant 0 : i32
    %c0_i32_0 = arith.constant 0 : i32
    %c0_i32_1 = arith.constant 0 : i32
    return %c0_i32, %c0_i32_0 : i32, i32
  }
  func.func @transform_3(%arg0: i32) -> (i32, i32) {
    %c0_i32 = arith.constant 0 : i32
    %c0_i32_0 = arith.constant 0 : i32
    %c0_i32_1 = arith.constant 0 : i32
    return %c0_i32, %c0_i32_0 : i32, i32
  }
  func.func @transform_4(%arg0: i32) -> (i32, i32) {
    %c0_i32 = arith.constant 0 : i32
    %c0_i32_0 = arith.constant 0 : i32
    %c0_i32_1 = arith.constant 0 : i32
    return %c0_i32, %c0_i32_0 : i32, i32
  }
  func.func @transform_5(%arg0: i32) -> (i32, i32) {
    %c0_i32 = arith.constant 0 : i32
    %c0_i32_0 = arith.constant 0 : i32
    return %c0_i32, %arg0 : i32, i32
  }
}

</mosaic_0001>

<bundles_post_ra>
// kernel: custom-call.18
= control target key start
LH: loop header
LB: loop body
LE: loop exit
PB: predicated region body
PF: predicated region fallthrough
CT: control target
= control target key end

     0   :  { %s6_s0 = inlined_call_operand.vmem [shape: f32[2,64], index: 0, kind: output, shape index: {}]  }

// kernel: neg.2
= control target key start
LH: loop header
LB: loop body
LE: loop exit
PB: predicated region body
PF: predicated region fallthrough
CT: control target
= control target key end

     0   :  { %s72_s0 = inlined_call_operand.vmem [shape: f32[2,16,32], index: 0, kind: input, shape index: {}]   ;;  %s73_s1 = inlined_call_operand.vmem [shape: f32[2,16,32], index: 1, kind: output, shape index: {}]  }
   0x1   :  { %v2_v0 = vld [vmem:[%s72_s0] sm:$0xff]  ;;  %v32_v1 = vld [vmem:[%s72_s0 + $0x10] sm:$0xff]  ;;  %v34_v2 = vld [vmem:[%s72_s0 + $0x8] sm:$0xff] }
   0x2   :  { %v5_v3 = vxor.u32 2147483648, %v2_v0  ;;  %v12_v4 = vxor.u32 2147483648, %v32_v1  ;;  %v20_v5 = vxor.u32 2147483648, %v34_v2  ;;  %v36_v6 = vld [vmem:[%s72_s0 + $0x18] sm:$0xff] }
   0x3   :  { %v28_v7 = vxor.u32 2147483648, %v36_v6 }
   0x4   :  { %7 = vst [vmem:[%s73_s1] sm:$0xff] %v5_v3  ;;  %33 = vst [vmem:[%s73_s1 + $0x10] sm:$0xff] %v12_v4 }
   0x5   :  { %35 = vst [vmem:[%s73_s1 + $0x8] sm:$0xff] %v20_v5  ;;  %37 = vst [vmem:[%s73_s1 + $0x18] sm:$0xff] %v28_v7 }

// kernel: forward.10
= control target key start
LH: loop header
LB: loop body
LE: loop exit
PB: predicated region body
PF: predicated region fallthrough
CT: control target
= control target key end

     0   :  { %vm38_vm0 = vcmask 261120   ;;  %v255_v3 = vmov 0   ;;  %v256_v11 = vmov 0.0|0.0   ;;  %vm257_vm1 = vmmov 0   ;;  %s324_s0 = inlined_call_operand.vmem [shape: f32[32,128], index: 0, kind: input, shape index: {}]   ;;  %s325_s1 = inlined_call_operand.vmem [shape: f32[16,32], index: 1, kind: input, shape index: {}]   ;;  %s326_s2 = inlined_call_operand.vmem [shape: f32[16,1], index: 2, kind: input, shape index: {}]   ;;  %s327_s4 = inlined_call_operand.vmem [shape: f32[8,1], index: 4, kind: input, shape index: {}]   ;;  %s328_s3 = inlined_call_operand.vmem [shape: f32[8,16], index: 3, kind: input, shape index: {}]   ;;  %s329_s5 = inlined_call_operand.vmem [shape: f32[8,128], index: 5, kind: output, shape index: {}]  }
   0x1   :  { %v20_v0 = vld [vmem:[%s324_s0] sm:$0xff]  ;;  %v21_v1 = vld [vmem:[%s324_s0 + $0x8] sm:$0xff]  ;;  %v22_v2 = vld [vmem:[%s324_s0 + $0x10] sm:$0xff]  ;;  %253 = vset.pattern.permute.xlu0 %v255_v3  ;;  %254 = vset.pattern.permute.xlu1 %v255_v3  ;;  %v258_v12 = vmov 0.0   ;;  %vm129_vm2 = vcmask 130048  }
   0x2   :  { %v238_v4 = vpack.c.bf16 %v21_v1, %v20_v0  ;;  %v23_v5 = vld [vmem:[%s324_s0 + $0x18] sm:$0xff]  ;;  %v24_v6 = vld [vmem:[%s325_s1] sm:$0xff]  ;;  %v27_v9 = vld [vmem:[%s326_s2 + $0x8] sm:$0xff]  ;;  %246 = vmatprep.subr.bf16.mxu1 %v256_v11  ;;  %235 = vmatprep.mubr.msk.f32.mxu1 %vm257_vm1, %v258_v12 }
   0x3   :  { %v242_v7 = vpack.c.bf16 %v23_v5, %v22_v2  ;;  %228 = vmatprep.mubr.msk.f32.mxu0 %vm38_vm0, %v24_v6  ;;  %v26_v8 = vld [vmem:[%s326_s2] sm:$0xff]  ;;  %v25_v10 = vld [vmem:[%s325_s1 + $0x8] sm:$0xff] }
   0x4   :  { %239 = vmatprep.subr.bf16.mxu0 %v238_v4  ;;  %30 = vperm.xlu0 %253, %v26_v8   ;;  %v123_v13 = vld [vmem:[%s327_s4] sm:$0xff] }
   0x5   :  { %241 = vmatpush3.bf16.msra.mxu0 %v238_v4  ;;  %126 = vperm.xlu1 %254, %v123_v13   ;;  %v122_v23 = vld [vmem:[%s328_s3] sm:$0xff] }
   0x6   :  { %243 = vmatprep.subr.bf16.mxu0 %v242_v7 }
   0x8   :  { %35 = vperm.xlu0 %253, %v27_v9  }
   0x9   :  { %245 = vmatpush3.bf16.msra.mxu0 %v242_v7 }
   0xc   :  { %229 = vmatmul.mubr.msk.f32.vlgmr.msra.gmra.mrb[0].mxu0 %vm38_vm0, %v25_v10 }
  0x83   :  { %v31_v14 = vpop.permute.xlu0 %30 }
  0x84   :  { %v127_v24 = vpop.permute.xlu1 %126 }
  0x87   :  { %v36_v15 = vpop.permute.xlu0 %35 }
  0xdf   :  { %v230_v16 = vpop.f32.mrb[0].mxu0 }
  0xe0   :  { %v117_v17 = vadd.f32 %v230_v16, %v36_v15  ;;  %v111_v18 = vpop.f32.mrb[1].mxu0 }
  0xe1   :  { %v112_v19 = vadd.f32 %v111_v18, %v31_v14 }
  0xe2   :  { %v121_v20 = vmax.f32 %v117_v17, 0.0 }
  0xe3   :  { %v120_v21 = vmax.f32 %v112_v19, 0.0 }
  0xe5   :  { %v247_v22 = vpack.c.bf16 %v121_v20, %v120_v21 }
  0xe7   :  { %248 = vmatpush3.bf16.msra.mxu1 %v247_v22 }
  0xea   :  { %236 = vmatmul.mubr.msk.f32.vlgmr.msra.gmra.mrb[0].mxu1 %vm129_vm2, %v122_v23 }
 0x1bd   :  { %v199_v25 = vpop.f32.mrb[0].mxu1 }
 0x1be   :  { %v200_v26 = vadd.f32 %v199_v25, %v127_v24  ;;  %v237_v27 = vpop.f32.mrb[1].mxu1 }
 0x1c0   :  { %203 = vst [vmem:[%s329_s5] sm:$0xff] %v200_v26 }

// kernel: forward.11
= control target key start
LH: loop header
LB: loop body
LE: loop exit
PB: predicated region body
PF: predicated region fallthrough
CT: control target
= control target key end

     0   :  { %s1212_s21 = smov 0   ;;  %s1214_s22 = smov 0   ;;  %s1311_s0 = inlined_call_operand.vmem [shape: f32[2,4,16,256], index: 0, kind: input, shape index: {}]   ;;  %s1312_s1 = inlined_call_operand.vmem [shape: f32[2,1,256], index: 1, kind: input, shape index: {}]   ;;  %s1313_s2 = inlined_call_operand.vmem [shape: f32[8,16], index: 2, kind: input, shape index: {}]   ;;  %s1314_s3 = inlined_call_operand.vmem [shape: f32[8,1], index: 3, kind: input, shape index: {}]   ;;  %s1315_s4 = inlined_call_operand.vmem [shape: f32[8,8], index: 4, kind: input, shape index: {}]   ;;  %s1316_s5 = inlined_call_operand.vmem [shape: f32[8,1], index: 5, kind: input, shape index: {}]   ;;  %s1317_s6 = inlined_call_operand.vmem [shape: f32[2,8,256], index: 6, kind: output, shape index: {}]  }
   0x1   :  { %s1216_s23 = smov 0  }
   0x2 LB: > { %s28_s24 = sadd.s32 1, %s1169_s22  ;;  %p1078_p0 = scmp.ge.s32.totalorder %s1173_s23, 1  ;;  %s1173_s23 = sphi %s1216_s23, %s16_s23   ;;  %s1169_s22 = sphi %s1214_s22, %s1319_s22   ;;  %s1165_s21 = sphi %s1212_s21, %s1318_s21  }
   0x3   : > { %p30_p1 = scmp.ge.s32.totalorder %s28_s24, 2  ;;  %p249_p2 = scmp.lt.s32.totalorder %s1173_s23, 3 }
   0x5   : > { %s1321_s24 = smov (%p30_p1, %s28_s24), 0  ;;  %p250_p3 = pnand %p1078_p0, %p249_p2 }
   0x6   : > { %p296_p4 = scmp.lt.s32.totalorder (!%p250_p3), %s1165_s21, 1  ;;  %v325_v0 = vld [vmem:[%s1314_s3] sm:$0xff] (!%p250_p3)  ;;  %v1175_v1 = vmov (!%p250_p3), 0.0   ;;  %v1176_v2 = vmov (!%p250_p3), 0   ;;  %vm337_vm0 = vcmask (!%p250_p3), 130048   ;;  %vm419_vm1 = vcmask (!%p250_p3), 64512  }
   0x7   : > { %253 = sbr.rel (%p250_p3) target bundleno = 695 (0x2b7), region = 44  ;;  %405 = vmatprep.mubr.f32.mxu0 (!%p250_p3), %v1175_v1  ;;  %1150 = vset.pattern.permute.xlu0 (!%p250_p3), %v1176_v2  ;;  %v327_v3 = vld [vmem:[%s1316_s5] sm:$0xff] (!%p250_p3)  ;;  %v958_v57 = vlaneseq (!%p250_p3) }
   0x8   : > { %334 = vperm.xlu0 (!%p250_p3), %1150, %v325_v0   ;;  %487 = vmatprep.mubr.f32.mxu1 (!%p250_p3), %v1175_v1  ;;  %v324_v10 = vld [vmem:[%s1313_s2] sm:$0xff] (!%p250_p3) }
   0x9   : > { %v326_v25 = vld [vmem:[%s1315_s4] sm:$0xff] (!%p250_p3)  ;;  %v959_v61 = vshrl.u32 (!%p250_p3), %v958_v57, 7 }
   0xc   : > { %416 = vperm.xlu0 (!%p250_p3), %1150, %v327_v3  }
   0xe   : > { %s1323_s21 = smov (!%p296_p4, %s1165_s21), 1 }
   0xf   : > { %s1106_s29 = sshll.u32 %s1323_s21, 7  ;;  %s1081_s13 = sshll.u32 %s1323_s21, 1 }
  0x10   : > { %s1245_s8 = scalar_lea.vmem %s1311_s0, %s1106_s29  ;;  %s312_s16 = scalar_lea.vmem %s1312_s1, %s1081_s13 }
  0x11   : > { %v329_v4 = vld [vmem:[%s1245_s8 + $0x8] sm:$0xff]  ;;  %v331_v5 = vld [vmem:[%s1245_s8 + $0x18] sm:$0xff]  ;;  %v328_v6 = vld [vmem:[%s1245_s8] sm:$0xff]  ;;  %s1107_s17 = sshll.u32 %s1323_s21, 4 }
  0x12   : > { %v1108_v7 = vpack.c.bf16 %v331_v5, %v329_v4  ;;  %v330_v8 = vld [vmem:[%s1245_s8 + $0x10] sm:$0xff]  ;;  %v1087_v15 = vld [vmem:[%s1245_s8 + $0x28] sm:$0xff]  ;;  %v1089_v16 = vld [vmem:[%s1245_s8 + $0x38] sm:$0xff]  ;;  %s322_s20 = scalar_lea.vmem %s1317_s6, %s1107_s17 }
  0x13   : > { %v1110_v9 = vpack.c.bf16 %v330_v8, %v328_v6  ;;  %v1086_v18 = vld [vmem:[%s1245_s8 + $0x20] sm:$0xff]  ;;  %v1088_v19 = vld [vmem:[%s1245_s8 + $0x30] sm:$0xff]  ;;  %v1093_v20 = vld [vmem:[%s1245_s8 + $0x48] sm:$0xff]  ;;  %v1112_v23 = vpack.c.bf16 %v1089_v16, %v1087_v15  ;;  %v960_v6 = vsub.s32 0, %v959_v61 }
  0x14   : > { %1109 = vmatprep.subr.bf16.mxu0 %v1108_v7  ;;  %v1095_v21 = vld [vmem:[%s1245_s8 + $0x58] sm:$0xff]  ;;  %v1114_v26 = vpack.c.bf16 %v1088_v19, %v1086_v18  ;;  %v1092_v28 = vld [vmem:[%s1245_s8 + $0x40] sm:$0xff]  ;;  %v1094_v29 = vld [vmem:[%s1245_s8 + $0x50] sm:$0xff] }
  0x15   : > { %1111 = vmatpush1.bf16.msra.mxu0 %v1110_v9  ;;  %v1116_v27 = vpack.c.bf16 %v1095_v21, %v1093_v20  ;;  %v1099_v30 = vld [vmem:[%s1245_s8 + $0x68] sm:$0xff]  ;;  %v1101_v31 = vld [vmem:[%s1245_s8 + $0x78] sm:$0xff]  ;;  %v1118_v32 = vpack.c.bf16 %v1094_v29, %v1092_v28  ;;  %v1098_v34 = vld [vmem:[%s1245_s8 + $0x60] sm:$0xff] }
  0x16   : > { %v1120_v33 = vpack.c.bf16 %v1101_v31, %v1099_v30  ;;  %v1100_v35 = vld [vmem:[%s1245_s8 + $0x70] sm:$0xff]  ;;  %v955_v59 = vld [vmem:[%s312_s16] sm:$0x3] }
  0x17   : > { %v1122_v36 = vpack.c.bf16 %v1100_v35, %v1098_v34  ;;  %vm956_vm2 = vcmp.gt.f32.partialorder %v955_v59, 0.0 }
  0x18   : > { %1084 = vmatmul.mubr.msk.f32.vlgmr.msra.gmra.mrb[0].mxu0 %vm337_vm0, %v324_v10 }
  0x19   : > { %638 = vmatprep.mubr.f32.mxu0 %v1175_v1 }
  0x87   : > { %v1256_v11 = vpop.permute.xlu0 %334 }
  0x8b   : > { %v417_v58 = vpop.permute.xlu0 %416 }
  0xeb   : > { %v407_v12 = vpop.f32.mrb[0].mxu0 }
  0xec   : > { %v408_v13 = vadd.f32 %v407_v12, %v1256_v11  ;;  %v409_v14 = vpop.f32.mrb[1].mxu0 }
  0xed   : > { %v410_v17 = vadd.f32 %v409_v14, %v1256_v11 }
  0xee   : > { %v412_v24 = vmax.f32 %v408_v13, 0.0 }
  0xef   : > { %v413_v22 = vmax.f32 %v410_v17, 0.0 }
  0xf1   : > { %423 = vmatprep.subr.mxu1 %v413_v22 }
  0xf2   : > { %424 = vmatpush1.msra.mxu1 %v412_v24 }
  0xf3   : > { %1085 = vmatmul.mubr.msk.f32.vlgmr.msra.gmra.mrb[0].mxu1 %vm419_vm1, %v326_v25  ;;  %1113 = vmatprep.subr.bf16.mxu1 %v1112_v23 }
  0xf4   : > { %1115 = vmatpush1.bf16.msra.mxu1 %v1114_v26  ;;  %565 = vmatprep.mubr.f32.mxu1 %v1175_v1 }
  0xf5   : > { %1117 = vmatprep.subr.bf16.mxu1 %v1116_v27 }
  0xf7   : > { %1090 = vmatmul.mubr.msk.f32.vlgmr.msra.gmra.mrb[2].mxu1 %vm337_vm0, %v324_v10 }
  0xf8   : > { %1119 = vmatpush1.bf16.msra.mxu1 %v1118_v32  ;;  %718 = vmatprep.mubr.f32.mxu1 %v1175_v1 }
  0xf9   : > { %1121 = vmatprep.subr.bf16.mxu1 %v1120_v33 }
  0xfb   : > { %1096 = vmatmul.mubr.msk.f32.vlgmr.msra.gmra.mrb[4].mxu1 %vm337_vm0, %v324_v10 }
  0xfc   : > { %1123 = vmatpush1.bf16.msra.mxu1 %v1122_v36  ;;  %871 = vmatprep.mubr.f32.mxu1 %v1175_v1 }
  0xff   : > { %1102 = vmatmul.mubr.msk.f32.vlgmr.msra.gmra.mrb[6].mxu1 %vm337_vm0, %v324_v10  ;;  %v964_v10 = vsub.s32 1, %v959_v61 }
 0x1c6   : > { %v489_v37 = vpop.f32.mrb[0].mxu1 }
 0x1c7   : > { %v491_v38 = vpop.f32.mrb[1].mxu1  ;;  %v490_v60 = vadd.f32 %v489_v37, %v417_v58 }
 0x1c8   : > { %v492_v62 = vadd.f32 %v491_v38, %v417_v58 }
 0x1c9   : > { %v494_v4 = vmax.f32 %v490_v60, 0.0 }
 0x1ca   : > { %v567_v39 = vpop.f32.mrb[2].mxu1  ;;  %v495_v7 = vmax.f32 %v492_v62, 0.0 }
 0x1cb   : > { %v568_v40 = vadd.f32 %v567_v39, %v1256_v11  ;;  %v569_v41 = vpop.f32.mrb[3].mxu1 }
 0x1cc   : > { %v570_v42 = vadd.f32 %v569_v41, %v1256_v11 }
 0x1cd   : > { %v572_v45 = vmax.f32 %v568_v40, 0.0 }
 0x1ce   : > { %v573_v43 = vmax.f32 %v570_v42, 0.0  ;;  %v720_v44 = vpop.f32.mrb[4].mxu1 }
 0x1cf   : > { %v721_v46 = vadd.f32 %v720_v44, %v1256_v11  ;;  %v722_v47 = vpop.f32.mrb[5].mxu1 }
 0x1d0   : > { %v723_v48 = vadd.f32 %v722_v47, %v1256_v11  ;;  %574 = vmatprep.subr.mxu0 %v573_v43 }
 0x1d1   : > { %575 = vmatpush1.msra.mxu0 %v572_v45  ;;  %v725_v51 = vmax.f32 %v721_v46, 0.0 }
 0x1d2   : > { %v726_v49 = vmax.f32 %v723_v48, 0.0  ;;  %1091 = vmatmul.mubr.msk.f32.vlgmr.msra.gmra.mrb[2].mxu0 %vm419_vm1, %v326_v25  ;;  %v873_v50 = vpop.f32.mrb[6].mxu1 }
 0x1d3   : > { %v874_v52 = vadd.f32 %v873_v50, %v1256_v11  ;;  %v875_v53 = vpop.f32.mrb[7].mxu1  ;;  %791 = vmatprep.mubr.f32.mxu0 %v1175_v1 }
 0x1d4   : > { %v876_v54 = vadd.f32 %v875_v53, %v1256_v11  ;;  %727 = vmatprep.subr.mxu0 %v726_v49  ;;  %v957_v11 = vsel %vm956_vm2, 1, %v1176_v2 }
 0x1d5   : > { %728 = vmatpush1.msra.mxu0 %v725_v51  ;;  %v878_v56 = vmax.f32 %v874_v52, 0.0  ;;  %v961_v18 = vrot.slane %v957_v11, %v960_v6  ;;  %v965_v21 = vrot.slane %v957_v11, %v964_v10 }
 0x1d6   : > { %v879_v55 = vmax.f32 %v876_v54, 0.0  ;;  %1097 = vmatmul.mubr.msk.f32.vlgmr.msra.gmra.mrb[4].mxu0 %vm419_vm1, %v326_v25 }
 0x1d7   : > { %944 = vmatprep.mubr.f32.mxu0 %v1175_v1  ;;  %vm966_vm3 = vcmp.eq.s32.totalorder %v961_v18, 1  ;;  %vm967_vm4 = vcmp.eq.s32.totalorder %v965_v21, 1 }
 0x1d8   : > { %880 = vmatprep.subr.mxu0 %v879_v55 }
 0x1d9   : > { %881 = vmatpush1.msra.mxu0 %v878_v56 }
 0x1da   : > { %1103 = vmatmul.mubr.msk.f32.vlgmr.msra.gmra.mrb[6].mxu0 %vm419_vm1, %v326_v25 }
 0x2a5   : > { %v640_v63 = vpop.f32.mrb[2].mxu0 }
 0x2a6   : > { %v641_v0 = vadd.f32 %v640_v63, %v417_v58  ;;  %v642_v3 = vpop.f32.mrb[3].mxu0 }
 0x2a7   : > { %v643_v1 = vadd.f32 %v642_v3, %v417_v58 }
 0x2a8   : > { %v645_v5 = vmax.f32 %v641_v0, 0.0 }
 0x2a9   : > { %v646_v8 = vmax.f32 %v643_v1, 0.0  ;;  %v793_v9 = vpop.f32.mrb[4].mxu0 }
 0x2aa   : > { %v647_v12 = vmax.f32 %v494_v4, %v645_v5  ;;  %v794_v13 = vadd.f32 %v793_v9, %v417_v58  ;;  %v795_v14 = vpop.f32.mrb[5].mxu0 }
 0x2ab   : > { %v648_v15 = vmax.f32 %v495_v7, %v646_v8  ;;  %v796_v16 = vadd.f32 %v795_v14, %v417_v58 }
 0x2ac   : > { %v798_v17 = vmax.f32 %v794_v13, 0.0 }
 0x2ad   : > { %v799_v19 = vmax.f32 %v796_v16, 0.0  ;;  %v946_v20 = vpop.f32.mrb[6].mxu0 }
 0x2ae   : > { %v800_v22 = vmax.f32 %v647_v12, %v798_v17  ;;  %v947_v23 = vadd.f32 %v946_v20, %v417_v58  ;;  %v948_v24 = vpop.f32.mrb[7].mxu0 }
 0x2af   : > { %v801_v25 = vmax.f32 %v648_v15, %v799_v19  ;;  %v949_v26 = vadd.f32 %v948_v24, %v417_v58 }
 0x2b0   : > { %v951_v27 = vmax.f32 %v947_v23, 0.0 }
 0x2b1   : > { %v952_v28 = vmax.f32 %v949_v26, 0.0 }
 0x2b2   : > { %v953_v2 = vmax.f32 %v800_v22, %v951_v27 }
 0x2b3   : > { %v954_v29 = vmax.f32 %v801_v25, %v952_v28 }
 0x2b4   : > { %v968_v30 = vsel %vm966_vm3, %v953_v2, 0.0 }
 0x2b5   : > { %970 = vst [vmem:[%s322_s20] sm:$0xff] %v968_v30  ;;  %v969_v31 = vsel %vm967_vm4, %v954_v29, 0.0 }
 0x2b6   : > { %971 = vst [vmem:[%s322_s20 + $0x8] sm:$0xff] %v969_v31 }
 0x2b7 PF: > { %s16_s23 = sadd.s32 1, %s1173_s23   ;;  %s1318_s21 = smov %s1169_s22 }
 0x2b8   : > { %p13_p5 = scmp.ge.s32.totalorder %s16_s23, 4   ;;  %s1319_s22 = smov %s1321_s24 }
 0x2ba   :  { %15 = sbr.rel (!%p13_p5) target bundleno = 2 (0x2), region = 80 }

// kernel: forward.12
= control target key start
LH: loop header
LB: loop body
LE: loop exit
PB: predicated region body
PF: predicated region fallthrough
CT: control target
= control target key end

     0   :  { %v632_v0 = vmov 0.0|0.0   ;;  %vm633_vm0 = vmmov 0   ;;  %v634_v3 = vmov 0.0   ;;  %v635_v6 = vmov 0   ;;  %s758_s2 = inlined_call_operand.vmem [shape: f32[16,16], index: 2, kind: input, shape index: {}]   ;;  %s759_s3 = inlined_call_operand.vmem [shape: f32[8,16], index: 3, kind: input, shape index: {}]   ;;  %s760_s5 = inlined_call_operand.vmem [shape: f32[8,1], index: 5, kind: input, shape index: {}]   ;;  %s761_s0 = inlined_call_operand.vmem [shape: f32[8,384], index: 0, kind: input, shape index: {}]   ;;  %s762_s4 = inlined_call_operand.vmem [shape: f32[8,8], index: 4, kind: input, shape index: {}]   ;;  %s763_s7 = inlined_call_operand.vmem [shape: f32[8,1], index: 7, kind: input, shape index: {}]   ;;  %s764_s1 = inlined_call_operand.vmem [shape: f32[16,384], index: 1, kind: input, shape index: {}]   ;;  %s765_s6 = inlined_call_operand.vmem [shape: f32[8,8], index: 6, kind: input, shape index: {}]   ;;  %s766_s8 = inlined_call_operand.vmem [shape: f32[8,384], index: 8, kind: output, shape index: {}]  }
   0x1   :  { %613 = vmatprep.subr.bf16.mxu0 %v632_v0  ;;  %v30_v1 = vld [vmem:[%s758_s2] sm:$0xff]  ;;  %v31_v2 = vld [vmem:[%s758_s2 + $0x8] sm:$0xff]  ;;  %593 = vmatprep.mubr.msk.f32.mxu0 %vm633_vm0, %v634_v3  ;;  %vm122_vm1 = vcmask 64512   ;;  %v121_v11 = vld [vmem:[%s761_s0 + $0x10] sm:$0xff]  ;;  %vm38_vm2 = vcmask 130048  }
   0x2   :  { %v614_v4 = vpack.c.bf16 %v31_v2, %v30_v1  ;;  %v29_v5 = vld [vmem:[%s759_s3] sm:$0xff]  ;;  %631 = vset.pattern.permute.xlu0 %v635_v6  ;;  %v120_v8 = vld [vmem:[%s761_s0 + $0x8] sm:$0xff]  ;;  %190 = vmatprep.mubr.f32.mxu1 %v634_v3  ;;  %v115_v17 = vld [vmem:[%s764_s1 + $0x18] sm:$0xff] }
   0x3   :  { %v32_v7 = vld [vmem:[%s760_s5] sm:$0xff]  ;;  %126 = vmatprep.subr.mxu1 %v120_v8  ;;  %v113_v13 = vld [vmem:[%s764_s1 + $0x8] sm:$0xff]  ;;  %v114_v19 = vld [vmem:[%s764_s1 + $0x10] sm:$0xff] }
   0x4   :  { %35 = vperm.xlu0 %631, %v32_v7   ;;  %v119_v9 = vld [vmem:[%s761_s0] sm:$0xff]  ;;  %615 = vmatpush3.bf16.msra.mxu0 %v614_v4  ;;  %v117_v20 = vld [vmem:[%s764_s1 + $0x28] sm:$0xff] }
   0x5   :  { %v118_v10 = vld [vmem:[%s762_s4] sm:$0xff]  ;;  %127 = vmatpush1.msra.mxu1 %v119_v9  ;;  %v621_v23 = vpack.c.bf16 %v117_v20, %v114_v19 }
   0x6   :  { %v415_v12 = vld [vmem:[%s763_s7] sm:$0xff]  ;;  %573 = vmatmul.mubr.msk.f32.vlgmr.msra.gmra.mrb[0].mxu1 %vm122_vm1, %v118_v10  ;;  %596 = vmatprep.subr.mxu1 %v634_v3 }
   0x7   :  { %v116_v14 = vld [vmem:[%s764_s1 + $0x20] sm:$0xff]  ;;  %597 = vmatpush3.msra.mxu1 %v121_v11  ;;  %598 = vmatprep.mubr.msk.f32.mxu1 %vm633_vm0, %v634_v3 }
   0x8   :  { %v616_v15 = vpack.c.bf16 %v116_v14, %v113_v13  ;;  %594 = vmatmul.mubr.msk.f32.vlgmr.msra.gmra.mrb[0].mxu0 %vm38_vm2, %v29_v5  ;;  %418 = vperm.xlu0 %631, %v415_v12   ;;  %v112_v16 = vld [vmem:[%s764_s1] sm:$0xff] }
   0x9   :  { %488 = vmatprep.mubr.f32.mxu0 %v634_v3  ;;  %v618_v18 = vpack.c.bf16 %v115_v17, %v112_v16  ;;  %v414_v30 = vld [vmem:[%s765_s6] sm:$0xff] }
   0xa   :  { %617 = vmatprep.subr.bf16.mxu1 %v616_v15  ;;  %599 = vmatmul.mubr.msk.f32.vlgmr.msra.gmra.mrb[2].mxu1 %vm122_vm1, %v118_v10 }
   0xb   :  { %334 = vmatprep.mubr.f32.mxu1 %v634_v3  ;;  %619 = vmatpush1.bf16.msra.mxu1 %v618_v18 }
   0xc   :  { %620 = vmatprep.subr.bf16.mxu1 %v632_v0 }
  0x83   :  { %v36_v21 = vpop.permute.xlu0 %35 }
  0x87   :  { %v419_v34 = vpop.permute.xlu0 %418 }
  0xdb   :  { %v108_v22 = vpop.f32.mrb[0].mxu0 }
  0xdc   :  { %v109_v24 = vadd.f32 %v108_v22, %v36_v21  ;;  %v595_v25 = vpop.f32.mrb[1].mxu0 }
  0xde   :  { %575 = vmatmul.mubr.msk.f32.vlgmr.msra.gmra.mrb[0].mxu1 %vm38_vm2, %v109_v24 }
  0xdf   :  { %622 = vmatpush3.bf16.msra.mxu1 %v621_v23  ;;  %605 = vmatprep.mubr.msk.f32.mxu1 %vm633_vm0, %v634_v3 }
  0xe2   :  { %606 = vmatmul.mubr.msk.f32.vlgmr.msra.gmra.mrb[2].mxu1 %vm38_vm2, %v109_v24 }
 0x1b1   :  { %v336_v26 = vpop.f32.mrb[0].mxu1 }
 0x1b2   :  { %v338_v27 = vpop.f32.mrb[1].mxu1  ;;  %v411_v29 = vmax.f32 %v336_v26, 0.0 }
 0x1b3   :  { %v412_v28 = vmax.f32 %v338_v27, 0.0 }
 0x1b5   :  { %v407_v31 = vpop.f32.mrb[2].mxu1  ;;  %424 = vmatprep.subr.mxu0 %v412_v28 }
 0x1b6   :  { %v413_v32 = vmax.f32 %v407_v31, 0.0  ;;  %v607_v33 = vpop.f32.mrb[3].mxu1  ;;  %425 = vmatpush1.msra.mxu0 %v411_v29 }
 0x1b7   :  { %577 = vmatmul.mubr.msk.f32.vlgmr.msra.gmra.mrb[2].mxu0 %vm122_vm1, %v414_v30  ;;  %608 = vmatprep.subr.mxu0 %v634_v3 }
 0x1b8   :  { %609 = vmatpush3.msra.mxu0 %v413_v32  ;;  %610 = vmatprep.mubr.msk.f32.mxu0 %vm633_vm0, %v634_v3 }
 0x1bb   :  { %611 = vmatmul.mubr.msk.f32.vlgmr.msra.gmra.mrb[4].mxu0 %vm122_vm1, %v414_v30 }
 0x28a   :  { %v490_v35 = vpop.f32.mrb[2].mxu0 }
 0x28b   :  { %v491_v36 = vadd.f32 %v490_v35, %v419_v34  ;;  %v492_v37 = vpop.f32.mrb[3].mxu0 }
 0x28c   :  { %v493_v38 = vadd.f32 %v492_v37, %v419_v34 }
 0x28d   :  { %565 = vst [vmem:[%s766_s8] sm:$0xff] %v491_v36 }
 0x28e   :  { %566 = vst [vmem:[%s766_s8 + $0x8] sm:$0xff] %v493_v38  ;;  %v561_v39 = vpop.f32.mrb[4].mxu0 }
 0x28f   :  { %v562_v40 = vadd.f32 %v561_v39, %v419_v34  ;;  %v612_v41 = vpop.f32.mrb[5].mxu0 }
 0x291   :  { %567 = vst [vmem:[%s766_s8 + $0x10] sm:$0xff] %v562_v40 }

// kernel: forward.17
= control target key start
LH: loop header
LB: loop body
LE: loop exit
PB: predicated region body
PF: predicated region fallthrough
CT: control target
= control target key end

     0   :  { %v121_v0 = vmov 0.0|0.0   ;;  %vm122_vm0 = vmmov 0   ;;  %v123_v3 = vmov 0.0   ;;  %v124_v5 = vmov 0   ;;  %s160_s0 = inlined_call_operand.vmem [shape: f32[16,128], index: 0, kind: input, shape index: {}]   ;;  %s161_s2 = inlined_call_operand.vmem [shape: f32[8,1], index: 2, kind: input, shape index: {}]   ;;  %s162_s1 = inlined_call_operand.vmem [shape: f32[8,16], index: 1, kind: input, shape index: {}]   ;;  %s163_s3 = inlined_call_operand.vmem [shape: f32[8,128], index: 3, kind: output, shape index: {}]  }
   0x1   :  { %113 = vmatprep.subr.bf16.mxu0 %v121_v0  ;;  %v14_v1 = vld [vmem:[%s160_s0] sm:$0xff]  ;;  %v15_v2 = vld [vmem:[%s160_s0 + $0x8] sm:$0xff]  ;;  %110 = vmatprep.mubr.msk.f32.mxu0 %vm122_vm0, %v123_v3  ;;  %vm23_vm1 = vcmask 130048  }
   0x2   :  { %v114_v4 = vpack.c.bf16 %v15_v2, %v14_v1  ;;  %120 = vset.pattern.permute.xlu0 %v124_v5  ;;  %v17_v6 = vld [vmem:[%s161_s2] sm:$0xff] }
   0x3   :  { %20 = vperm.xlu0 %120, %v17_v6   ;;  %v16_v7 = vld [vmem:[%s162_s1] sm:$0xff] }
   0x4   :  { %115 = vmatpush3.bf16.msra.mxu0 %v114_v4 }
   0x7   :  { %111 = vmatmul.mubr.msk.f32.vlgmr.msra.gmra.mrb[0].mxu0 %vm23_vm1, %v16_v7 }
  0x82   :  { %v21_v8 = vpop.permute.xlu0 %20 }
  0xda   :  { %v93_v9 = vpop.f32.mrb[0].mxu0 }
  0xdb   :  { %v94_v10 = vadd.f32 %v93_v9, %v21_v8  ;;  %v112_v11 = vpop.f32.mrb[1].mxu0 }
  0xdd   :  { %97 = vst [vmem:[%s163_s3] sm:$0xff] %v94_v10 }

// kernel: forward.18
= control target key start
LH: loop header
LB: loop body
LE: loop exit
PB: predicated region body
PF: predicated region fallthrough
CT: control target
= control target key end

     0   :  { %vm51_vm0 = vcmask 195584   ;;  %v312_v2 = vmov 0   ;;  %vm167_vm1 = vcmask 261120   ;;  %s400_s0 = inlined_call_operand.vmem [shape: f32[24,128], index: 0, kind: input, shape index: {}]   ;;  %s401_s1 = inlined_call_operand.vmem [shape: f32[32,24], index: 1, kind: input, shape index: {}]   ;;  %s402_s2 = inlined_call_operand.vmem [shape: f32[32,1], index: 2, kind: input, shape index: {}]   ;;  %s403_s4 = inlined_call_operand.vmem [shape: f32[16,1], index: 4, kind: input, shape index: {}]   ;;  %s404_s3 = inlined_call_operand.vmem [shape: f32[16,32], index: 3, kind: input, shape index: {}]   ;;  %s405_s5 = inlined_call_operand.vmem [shape: f32[16,128], index: 5, kind: output, shape index: {}]  }
   0x1   :  { %v20_v0 = vld [vmem:[%s400_s0] sm:$0xff]  ;;  %v21_v1 = vld [vmem:[%s400_s0 + $0x8] sm:$0xff]  ;;  %310 = vset.pattern.permute.xlu0 %v312_v2  ;;  %311 = vset.pattern.permute.xlu1 %v312_v2  ;;  %v22_v5 = vld [vmem:[%s400_s0 + $0x10] sm:$0xff] }
   0x2   :  { %v297_v3 = vpack.c.bf16 %v21_v1, %v20_v0  ;;  %v23_v4 = vld [vmem:[%s401_s1] sm:$0xff]  ;;  %v29_v7 = vld [vmem:[%s402_s2 + $0x10] sm:$0xff]  ;;  %v28_v8 = vld [vmem:[%s402_s2 + $0x8] sm:$0xff] }
   0x3   :  { %280 = vmatprep.mubr.msk.f32.mxu0 %vm51_vm0, %v23_v4  ;;  %v27_v6 = vld [vmem:[%s402_s2] sm:$0xff]  ;;  %43 = vperm.xlu1 %311, %v29_v7   ;;  %v30_v9 = vld [vmem:[%s402_s2 + $0x18] sm:$0xff]  ;;  %v24_v10 = vld [vmem:[%s401_s1 + $0x8] sm:$0xff] }
   0x4   :  { %298 = vmatprep.subr.bf16.mxu0 %v297_v3  ;;  %33 = vperm.xlu0 %310, %v27_v6   ;;  %v25_v11 = vld [vmem:[%s401_s1 + $0x10] sm:$0xff]  ;;  %v155_v12 = vld [vmem:[%s403_s4] sm:$0xff]  ;;  %v156_v13 = vld [vmem:[%s403_s4 + $0x8] sm:$0xff] }
   0x5   :  { %300 = vmatpush3.bf16.msra.mxu0 %v297_v3  ;;  %v26_v14 = vld [vmem:[%s401_s1 + $0x18] sm:$0xff]  ;;  %v153_v15 = vld [vmem:[%s404_s3] sm:$0xff]  ;;  %v154_v34 = vld [vmem:[%s404_s3 + $0x8] sm:$0xff] }
   0x6   :  { %278 = vmatprep.subr.mxu0 %v22_v5  ;;  %294 = vmatprep.mubr.msk.f32.mxu1 %vm167_vm1, %v153_v15 }
   0x7   :  { %48 = vperm.xlu1 %311, %v30_v9  }
   0x8   :  { %38 = vperm.xlu0 %310, %v28_v8  }
   0x9   :  { %279 = vmatpush3.msra.mxu0 %v22_v5 }
   0xa   :  { %281 = vmatmul.mubr.msk.f32.vlgmr.msra.gmra.mrb[0].mxu0 %vm51_vm0, %v24_v10 }
   0xb   :  { %283 = vmatprep.mubr.msk.f32.mxu0 %vm51_vm0, %v25_v11  ;;  %164 = vperm.xlu1 %311, %v156_v13  }
   0xc   :  { %159 = vperm.xlu0 %310, %v155_v12  }
   0xe   :  { %284 = vmatmul.mubr.msk.f32.gmra.mrb[2].mxu0 %vm51_vm0, %v26_v14 }
  0x82   :  { %v44_v17 = vpop.permute.xlu1 %43 }
  0x83   :  { %v34_v16 = vpop.permute.xlu0 %33 }
  0x86   :  { %v49_v24 = vpop.permute.xlu1 %48 }
  0x87   :  { %v39_v18 = vpop.permute.xlu0 %38 }
  0x8a   :  { %v165_v35 = vpop.permute.xlu1 %164 }
  0x8b   :  { %v160_v37 = vpop.permute.xlu0 %159 }
  0xdd   :  { %v282_v19 = vpop.f32.mrb[0].mxu0 }
  0xde   :  { %v136_v20 = vadd.f32 %v282_v19, %v39_v18  ;;  %v130_v21 = vpop.f32.mrb[1].mxu0 }
  0xdf   :  { %v131_v22 = vadd.f32 %v130_v21, %v34_v16 }
  0xe0   :  { %v150_v23 = vmax.f32 %v136_v20, 0.0 }
  0xe1   :  { %v149_v25 = vmax.f32 %v131_v22, 0.0  ;;  %v285_v26 = vpop.f32.mrb[2].mxu0 }
  0xe2   :  { %v146_v27 = vadd.f32 %v285_v26, %v49_v24  ;;  %v140_v28 = vpop.f32.mrb[3].mxu0 }
  0xe3   :  { %v141_v29 = vadd.f32 %v140_v28, %v44_v17  ;;  %v301_v30 = vpack.c.bf16 %v150_v23, %v149_v25 }
  0xe4   :  { %v152_v31 = vmax.f32 %v146_v27, 0.0 }
  0xe5   :  { %v151_v32 = vmax.f32 %v141_v29, 0.0  ;;  %302 = vmatprep.subr.bf16.mxu1 %v301_v30 }
  0xe6   :  { %304 = vmatpush3.bf16.msra.mxu1 %v301_v30 }
  0xe7   :  { %v305_v33 = vpack.c.bf16 %v152_v31, %v151_v32 }
  0xe9   :  { %306 = vmatprep.subr.bf16.mxu1 %v305_v33 }
  0xea   :  { %308 = vmatpush3.bf16.msra.mxu1 %v305_v33 }
  0xed   :  { %295 = vmatmul.mubr.msk.f32.vlgmr.msra.gmra.mrb[0].mxu1 %vm167_vm1, %v154_v34 }
 0x1c0   :  { %v296_v36 = vpop.f32.mrb[0].mxu1 }
 0x1c1   :  { %v246_v38 = vadd.f32 %v296_v36, %v165_v35  ;;  %v240_v39 = vpop.f32.mrb[1].mxu1 }
 0x1c2   :  { %v241_v40 = vadd.f32 %v240_v39, %v160_v37 }
 0x1c3   :  { %250 = vst [vmem:[%s405_s5 + $0x8] sm:$0xff] %v246_v38 }
 0x1c4   :  { %249 = vst [vmem:[%s405_s5] sm:$0xff] %v241_v40 }

// kernel: mul.13
= control target key start
LH: loop header
LB: loop body
LE: loop exit
PB: predicated region body
PF: predicated region fallthrough
CT: control target
= control target key end

     0   :  { %3 = vsyncpa [#allocation1], 0  ;;  %s104_s0 = inlined_call_operand.vmem [shape: s32[2,8,72], index: 0, kind: input, shape index: {}]   ;;  %s105_s1 = inlined_call_operand.vmem [shape: s32[2,8,72], index: 1, kind: input, shape index: {}]   ;;  %s106_s2 = inlined_call_operand.hbm [shape: s32[2,8,72], index: 2, kind: output, shape index: {}]  }
   0x1   :  { %v4_v0 = vld [vmem:[%s104_s0] sm:$0xff]  ;;  %v33_v3 = vld [vmem:[%s104_s0 + $0x8] sm:$0xff] }
   0x2   :  { %v5_v1 = vld [vmem:[%s105_s1] sm:$0xff]  ;;  %v34_v4 = vld [vmem:[%s105_s1 + $0x8] sm:$0xff]  ;;  %s62_s1 = smov [#allocation0]  }
   0x3   :  { %v8_v2 = vmul.u32 %v5_v1, %v4_v0  ;;  %s24_s16 = sshll.u32 %s62_s1, 4  ;;  %v17_v5 = vmul.u32 %v34_v4, %v33_v3  ;;  %s25_s16 = int_to_ptr.vmem [resolvable:$true] %s24_s16 }
   0x4   :  { %s38_s17 = scalar_lea.vmem %s25_s16, 256  ;;  %p43_p1 = scmp.lt.s32.totalorder %s25_s16, %s25_s16 }
   0x5   :  { %10 = vst [vmem:[#allocation0] sm:$0xff] %v8_v2  ;;  %20 = vst [vmem:[#allocation0 + $0x8] sm:$0xff] %v17_v5  ;;  %p39_p0 = scmp.ne.s32.totalorder %s25_s16, %s38_s17  ;;  %p44_p2 = scmp.lt.s32.totalorder %s38_s17, %s38_s17 }
   0x7   :  { %p45_p3 = por %p44_p2, %p43_p1 }
   0x9   :  { %p46_p4 = pnand %p45_p3, %p39_p0 }
   0xb   :  { %49 = shalt.err (!%p46_p4)
}
   0xc   :  { %s50_s20 = scalar_lea.hbm %s106_s2, 256 }
   0xd   :  { %p51_p5 = scmp.ne.s32.totalorder %s106_s2, %s50_s20  ;;  %p54_p6 = scmp.lt.u32.totalorder %s50_s20, %s106_s2 }
   0xf   :  { %p56_p7 = pnand %p54_p6, %p51_p5 }
  0x11   :  { %59 = shalt.err (!%p56_p7)
}
  0x12   :  { %s63_s25 = smov 128   ;;  %s64_s26 = smov 8  }
  0x13   :  { %30 = dma.vmem_to_hbm [thread:$0]  %s25_s16, 256, %s106_s2, [#allocation1], %s63_s25, %s63_s25, %s64_s26  }
  0x14   :  { %60 = dma.done.wait [#allocation1], 256  }
  0x15   :  { %61 = vsyncadd [#allocation1], 4294967040 }
  0x16   :  { %32 = vsyncpa [#allocation1], 1 }

// kernel: mul.14
= control target key start
LH: loop header
LB: loop body
LE: loop exit
PB: predicated region body
PF: predicated region fallthrough
CT: control target
= control target key end

     0   :  { %3 = vsyncpa [#allocation1], 0  ;;  %s104_s0 = inlined_call_operand.vmem [shape: s32[2,8,96], index: 0, kind: input, shape index: {}]   ;;  %s105_s1 = inlined_call_operand.vmem [shape: s32[2,8,96], index: 1, kind: input, shape index: {}]   ;;  %s106_s2 = inlined_call_operand.hbm [shape: s32[2,8,96], index: 2, kind: output, shape index: {}]  }
   0x1   :  { %v4_v0 = vld [vmem:[%s104_s0] sm:$0xff]  ;;  %v33_v3 = vld [vmem:[%s104_s0 + $0x8] sm:$0xff] }
   0x2   :  { %v5_v1 = vld [vmem:[%s105_s1] sm:$0xff]  ;;  %v34_v4 = vld [vmem:[%s105_s1 + $0x8] sm:$0xff]  ;;  %s62_s1 = smov [#allocation0]  }
   0x3   :  { %v8_v2 = vmul.u32 %v5_v1, %v4_v0  ;;  %s24_s16 = sshll.u32 %s62_s1, 4  ;;  %v17_v5 = vmul.u32 %v34_v4, %v33_v3  ;;  %s25_s16 = int_to_ptr.vmem [resolvable:$true] %s24_s16 }
   0x4   :  { %s38_s17 = scalar_lea.vmem %s25_s16, 256  ;;  %p43_p1 = scmp.lt.s32.totalorder %s25_s16, %s25_s16 }
   0x5   :  { %10 = vst [vmem:[#allocation0] sm:$0xff] %v8_v2  ;;  %20 = vst [vmem:[#allocation0 + $0x8] sm:$0xff] %v17_v5  ;;  %p39_p0 = scmp.ne.s32.totalorder %s25_s16, %s38_s17  ;;  %p44_p2 = scmp.lt.s32.totalorder %s38_s17, %s38_s17 }
   0x7   :  { %p45_p3 = por %p44_p2, %p43_p1 }
   0x9   :  { %p46_p4 = pnand %p45_p3, %p39_p0 }
   0xb   :  { %49 = shalt.err (!%p46_p4)
}
   0xc   :  { %s50_s20 = scalar_lea.hbm %s106_s2, 256 }
   0xd   :  { %p51_p5 = scmp.ne.s32.totalorder %s106_s2, %s50_s20  ;;  %p54_p6 = scmp.lt.u32.totalorder %s50_s20, %s106_s2 }
   0xf   :  { %p56_p7 = pnand %p54_p6, %p51_p5 }
  0x11   :  { %59 = shalt.err (!%p56_p7)
}
  0x12   :  { %s63_s25 = smov 128   ;;  %s64_s26 = smov 8  }
  0x13   :  { %30 = dma.vmem_to_hbm [thread:$0]  %s25_s16, 256, %s106_s2, [#allocation1], %s63_s25, %s63_s25, %s64_s26  }
  0x14   :  { %60 = dma.done.wait [#allocation1], 256  }
  0x15   :  { %61 = vsyncadd [#allocation1], 4294967040 }
  0x16   :  { %32 = vsyncpa [#allocation1], 1 }

// kernel: forward.19
= control target key start
LH: loop header
LB: loop body
LE: loop exit
PB: predicated region body
PF: predicated region fallthrough
CT: control target
= control target key end

     0   :  { %vm52_vm0 = vcmask 261120   ;;  %v319_v3 = vmov 0   ;;  %s410_s0 = inlined_call_operand.vmem [shape: f32[32,128], index: 0, kind: input, shape index: {}]   ;;  %s411_s1 = inlined_call_operand.vmem [shape: f32[32,32], index: 1, kind: input, shape index: {}]   ;;  %s412_s2 = inlined_call_operand.vmem [shape: f32[32,1], index: 2, kind: input, shape index: {}]   ;;  %s413_s4 = inlined_call_operand.vmem [shape: f32[16,1], index: 4, kind: input, shape index: {}]   ;;  %s414_s3 = inlined_call_operand.vmem [shape: f32[16,32], index: 3, kind: input, shape index: {}]   ;;  %s415_s5 = inlined_call_operand.vmem [shape: f32[16,128], index: 5, kind: output, shape index: {}]  }
   0x1   :  { %v20_v0 = vld [vmem:[%s410_s0] sm:$0xff]  ;;  %v21_v1 = vld [vmem:[%s410_s0 + $0x8] sm:$0xff]  ;;  %v22_v2 = vld [vmem:[%s410_s0 + $0x10] sm:$0xff]  ;;  %317 = vset.pattern.permute.xlu0 %v319_v3  ;;  %318 = vset.pattern.permute.xlu1 %v319_v3 }
   0x2   :  { %v300_v4 = vpack.c.bf16 %v21_v1, %v20_v0  ;;  %v23_v5 = vld [vmem:[%s410_s0 + $0x18] sm:$0xff]  ;;  %v24_v6 = vld [vmem:[%s411_s1] sm:$0xff]  ;;  %v30_v9 = vld [vmem:[%s412_s2 + $0x10] sm:$0xff] }
   0x3   :  { %v304_v7 = vpack.c.bf16 %v23_v5, %v22_v2  ;;  %283 = vmatprep.mubr.msk.f32.mxu0 %vm52_vm0, %v24_v6  ;;  %v28_v8 = vld [vmem:[%s412_s2] sm:$0xff]  ;;  %44 = vperm.xlu1 %318, %v30_v9   ;;  %v29_v10 = vld [vmem:[%s412_s2 + $0x8] sm:$0xff]  ;;  %v31_v11 = vld [vmem:[%s412_s2 + $0x18] sm:$0xff] }
   0x4   :  { %301 = vmatprep.subr.bf16.mxu0 %v300_v4  ;;  %34 = vperm.xlu0 %317, %v28_v8   ;;  %v25_v12 = vld [vmem:[%s411_s1 + $0x8] sm:$0xff]  ;;  %v156_v13 = vld [vmem:[%s413_s4] sm:$0xff]  ;;  %v26_v14 = vld [vmem:[%s411_s1 + $0x10] sm:$0xff] }
   0x5   :  { %303 = vmatpush3.bf16.msra.mxu0 %v300_v4  ;;  %v157_v15 = vld [vmem:[%s413_s4 + $0x8] sm:$0xff]  ;;  %v27_v16 = vld [vmem:[%s411_s1 + $0x18] sm:$0xff]  ;;  %v154_v17 = vld [vmem:[%s414_s3] sm:$0xff] }
   0x6   :  { %305 = vmatprep.subr.bf16.mxu0 %v304_v7  ;;  %297 = vmatprep.mubr.msk.f32.mxu1 %vm52_vm0, %v154_v17  ;;  %v155_v36 = vld [vmem:[%s414_s3 + $0x8] sm:$0xff] }
   0x7   :  { %49 = vperm.xlu1 %318, %v31_v11  }
   0x8   :  { %39 = vperm.xlu0 %317, %v29_v10  }
   0x9   :  { %307 = vmatpush3.bf16.msra.mxu0 %v304_v7 }
   0xb   :  { %165 = vperm.xlu1 %318, %v157_v15  }
   0xc   :  { %284 = vmatmul.mubr.msk.f32.vlgmr.msra.gmra.mrb[0].mxu0 %vm52_vm0, %v25_v12  ;;  %160 = vperm.xlu0 %317, %v156_v13  }
   0xd   :  { %286 = vmatprep.mubr.msk.f32.mxu0 %vm52_vm0, %v26_v14 }
  0x10   :  { %287 = vmatmul.mubr.msk.f32.gmra.mrb[2].mxu0 %vm52_vm0, %v27_v16 }
  0x82   :  { %v45_v19 = vpop.permute.xlu1 %44 }
  0x83   :  { %v35_v18 = vpop.permute.xlu0 %34 }
  0x86   :  { %v50_v26 = vpop.permute.xlu1 %49 }
  0x87   :  { %v40_v20 = vpop.permute.xlu0 %39 }
  0x8a   :  { %v166_v37 = vpop.permute.xlu1 %165 }
  0x8b   :  { %v161_v39 = vpop.permute.xlu0 %160 }
  0xdf   :  { %v285_v21 = vpop.f32.mrb[0].mxu0 }
  0xe0   :  { %v137_v22 = vadd.f32 %v285_v21, %v40_v20  ;;  %v131_v23 = vpop.f32.mrb[1].mxu0 }
  0xe1   :  { %v132_v24 = vadd.f32 %v131_v23, %v35_v18 }
  0xe2   :  { %v151_v25 = vmax.f32 %v137_v22, 0.0 }
  0xe3   :  { %v150_v27 = vmax.f32 %v132_v24, 0.0  ;;  %v288_v28 = vpop.f32.mrb[2].mxu0 }
  0xe4   :  { %v147_v29 = vadd.f32 %v288_v28, %v50_v26  ;;  %v141_v30 = vpop.f32.mrb[3].mxu0 }
  0xe5   :  { %v142_v31 = vadd.f32 %v141_v30, %v45_v19  ;;  %v308_v32 = vpack.c.bf16 %v151_v25, %v150_v27 }
  0xe6   :  { %v153_v33 = vmax.f32 %v147_v29, 0.0 }
  0xe7   :  { %v152_v34 = vmax.f32 %v142_v31, 0.0  ;;  %309 = vmatprep.subr.bf16.mxu1 %v308_v32 }
  0xe8   :  { %311 = vmatpush3.bf16.msra.mxu1 %v308_v32 }
  0xe9   :  { %v312_v35 = vpack.c.bf16 %v153_v33, %v152_v34 }
  0xeb   :  { %313 = vmatprep.subr.bf16.mxu1 %v312_v35 }
  0xec   :  { %315 = vmatpush3.bf16.msra.mxu1 %v312_v35 }
  0xef   :  { %298 = vmatmul.mubr.msk.f32.vlgmr.msra.gmra.mrb[0].mxu1 %vm52_vm0, %v155_v36 }
 0x1c2   :  { %v299_v38 = vpop.f32.mrb[0].mxu1 }
 0x1c3   :  { %v246_v40 = vadd.f32 %v299_v38, %v166_v37  ;;  %v240_v41 = vpop.f32.mrb[1].mxu1 }
 0x1c4   :  { %v241_v42 = vadd.f32 %v240_v41, %v161_v39 }
 0x1c5   :  { %250 = vst [vmem:[%s415_s5 + $0x8] sm:$0xff] %v246_v40 }
 0x1c6   :  { %249 = vst [vmem:[%s415_s5] sm:$0xff] %v241_v42 }

</bundles_post_ra>
